<compile_context>
chip_gen: v5e
topology: v5e:2x2
jax: 0.10.0
libtpu: 0.0.40
codegen_flags: <defaults>
</compile_context>

<pallas_src>
import jax
import jax.numpy as jnp
from jax import lax
from jax.experimental import pallas as pl
from jax.experimental.pallas import tpu as pltpu


# ----- packed epilogue-parameter buffer layout (f32, lane offsets 128-aligned) -----
_B1_OFF, _B2_OFF, _B3_OFF, _B4_OFF, _B5_OFF = 0, 256, 768, 1024, 1152
_W6_OFF, _B6_OFF = 1280, 1408
_PACK_LEN = 1536


def _round_up(v, m):
    return ((v + m - 1) // m) * m


def mlp_kernel(x_ref, w1, w2, w3, w4, w5, pk_ref, o_ref):
    """Fused 6-layer MLP forward for one batch tile.

    BN affines are pre-folded into the following layer's weights, so each hidden
    layer is dot(bf16 x bf16 -> f32) + f32 bias + relu; activations are stored in
    bf16 between layers (the cast just moves before the store, values fed to each
    matmul are bit-identical to casting at the dot).
    """
    # TODO(synk): Dropout(0.2) is identity in eval mode; training-mode dropout and
    # batch-statistics BatchNorm are not modeled here.

    def layer(h, w_ref, off, size):
        b = pk_ref[:, off:off + size]                       # (1, size) f32
        z = jnp.dot(h, w_ref[...], preferred_element_type=jnp.float32) + b
        return jnp.maximum(z, 0.0)                          # f32 relu epilogue

    h = x_ref[...].astype(jnp.bfloat16)
    h = layer(h, w1, _B1_OFF, 256).astype(jnp.bfloat16)
    h = layer(h, w2, _B2_OFF, 512).astype(jnp.bfloat16)
    h = layer(h, w3, _B3_OFF, 256).astype(jnp.bfloat16)
    h = layer(h, w4, _B4_OFF, 128).astype(jnp.bfloat16)
    h = layer(h, w5, _B5_OFF, 128)                          # f32, (tile_b, 128)

    # fc6: contract the (zero-padded) 128-wide fc6 row against h's feature axis
    # ((1,128) . (tile_b,128)^T) so the result comes out lane-dense as (1, tile_b).
    w6_row = pk_ref[:, _W6_OFF:_W6_OFF + 128]               # (1, 128) f32
    b6 = pk_ref[:, _B6_OFF:_B6_OFF + 1]                     # (1, 1)   f32
    row = lax.dot_general(w6_row, h, (((1,), (1,)), ((), ())),
                          preferred_element_type=jnp.float32) + b6
    o_ref[...] = row.reshape(o_ref.shape).astype(o_ref.dtype)


def neural_net_forward(x, kparams):
    """x: [B, input_size] f32.  kparams produced by fold_params()."""
    B, F = x.shape
    w1, w2, w3, w4, w5 = kparams["weights"]    # bf16, stored [in, out]
    packed = kparams["packed"]                 # (1, _PACK_LEN) f32

    # Batch tile selection:
    #   * small batches: one 8-aligned block (single grid step);
    #   * large batches: 512-row tiles (1024 for very large B), 128-aligned for
    #     clean v5e MXU shapes, capped so the grid always has >= 2 steps when
    #     B > 256 (keeps both v7x TensorCores busy via "parallel" semantics).
    if B <= 256:
        tile_b = max(8, _round_up(B, 8))
    else:
        target = 1024 if B >= 4096 else 512
        tile_b = min(target, _round_up(_round_up(B, 256) // 2, 128))
    padded_B = _round_up(B, tile_b)
    if padded_B != B:
        x = jnp.pad(x, ((0, padded_B - B), (0, 0)))
    num_tiles = padded_B // tile_b

    const = lambda i: (0, 0)   # weights / packed params resident across grid steps

    flops = 2 * padded_B * (F * 256 + 256 * 512 + 512 * 256
                            + 256 * 128 + 128 * 128 + 128)
    bytes_accessed = (sum(int(w.size) * w.dtype.itemsize
                          for w in (w1, w2, w3, w4, w5))
                      + int(packed.size) * 4
                      + padded_B * F * 4 + padded_B * 4)

    out = pl.pallas_call(
        mlp_kernel,
        out_shape=jax.ShapeDtypeStruct((num_tiles, 1, tile_b), jnp.float32),
        grid=(num_tiles,),
        in_specs=[
            pl.BlockSpec((tile_b, F), lambda i: (i, 0)),    # x: tiled over batch
            pl.BlockSpec(w1.shape, const),
            pl.BlockSpec(w2.shape, const),
            pl.BlockSpec(w3.shape, const),
            pl.BlockSpec(w4.shape, const),
            pl.BlockSpec(w5.shape, const),
            pl.BlockSpec(packed.shape, const),
        ],
        # Lane-dense output block: (1, 1, tile_b) -> unmasked lanes, contiguous
        # per-step HBM writeback (vs. the masked 1-lane stores of a (tile_b, 1)
        # column block).
        out_specs=pl.BlockSpec((1, 1, tile_b), lambda i: (i, 0, 0)),
        compiler_params=pltpu.CompilerParams(
            dimension_semantics=("parallel",)),             # 2 TCs on v7x
        cost_estimate=pl.CostEstimate(flops=flops, transcendentals=0,
                                      bytes_accessed=bytes_accessed),
    )(x, w1, w2, w3, w4, w5, packed)
    return out.reshape(padded_B, 1)[:B]


def init_params(input_size, key):
    """Original (unfolded) parameters matching the PyTorch module's shapes."""
    dims = [input_size, 256, 512, 256, 128, 64, 1]
    eps = 1e-5
    layers = []
    for li in range(6):
        fan_in, fan_out = dims[li], dims[li + 1]
        key, kw, kb, kg, kbe, km, kv = jax.random.split(key, 7)
        bound = 1.0 / jnp.sqrt(jnp.float32(fan_in))
        # stored as [in, out] (transpose of torch's [out, in]) -> y = x @ W + b
        w = jax.random.uniform(kw, (fan_in, fan_out), jnp.float32, -bound, bound)
        b = jax.random.uniform(kb, (1, fan_out), jnp.float32, -bound, bound)
        if li < 5:
            gamma = 1.0 + 0.1 * jax.random.normal(kg, (1, fan_out), jnp.float32)
            beta = 0.1 * jax.random.normal(kbe, (1, fan_out), jnp.float32)
            mean = 0.1 * jax.random.normal(km, (1, fan_out), jnp.float32)
            var = jnp.abs(1.0 + 0.1 * jax.random.normal(kv, (1, fan_out),
                                                        jnp.float32))
            scale = gamma / jnp.sqrt(var + eps)
            shift = beta - mean * scale
            layers.append((w, b, scale, shift))
        else:
            layers.append((w, b))
    return {"layers": layers}


def fold_params(params):
    """Fold eval-mode BN affines into the NEXT linear layer and pack kernel inputs.

      W'_{l+1} = scale_l[:, None] * W_{l+1}
      b'_{l+1} = b_{l+1} + shift_l @ W_{l+1}

    Additionally zero-pads fc5's output dim (and b5, and the fc6 row) 64 -> 128 so
    the last hidden activation and the fc6 contraction are full-lane.  Returns
    bf16 weights for fc1..fc5 plus one packed f32 buffer holding the five folded
    biases, the folded fc6 row (padded to 128) and the folded fc6 bias.
    """
    layers = params["layers"]
    folded_w, folded_b = [], []
    prev_scale, prev_shift = None, None
    for li, p in enumerate(layers):
        if li < 5:
            w, b, scale, shift = p
        else:
            w, b = p
        if prev_scale is not None:
            b = b + prev_shift @ w                 # uses the ORIGINAL W
            w = w * prev_scale.reshape(-1, 1)
        folded_w.append(w)
        folded_b.append(b)
        if li < 5:
            prev_scale, prev_shift = scale, shift

    # Zero-pad fc5 output dim and the fc6 row from 64 to 128 lanes.
    w5_pad = jnp.pad(folded_w[4], ((0, 0), (0, 64)))          # (128, 128)
    b5_pad = jnp.pad(folded_b[4], ((0, 0), (0, 64)))          # (1, 128)
    w6_row = jnp.pad(folded_w[5].reshape(1, 64), ((0, 0), (0, 64)))  # (1, 128)

    packed = jnp.zeros((1, _PACK_LEN), jnp.float32)
    for off, b in zip((_B1_OFF, _B2_OFF, _B3_OFF, _B4_OFF),
                      folded_b[:4]):
        packed = packed.at[:, off:off + b.shape[1]].set(b)
    packed = packed.at[:, _B5_OFF:_B5_OFF + 128].set(b5_pad)
    packed = packed.at[:, _W6_OFF:_W6_OFF + 128].set(w6_row)
    packed = packed.at[:, _B6_OFF:_B6_OFF + 1].set(folded_b[5])

    weights = tuple(w.astype(jnp.bfloat16)
                    for w in (folded_w[0], folded_w[1], folded_w[2],
                              folded_w[3], w5_pad))
    return {"weights": weights, "packed": packed}


def reference_forward_bf16(x, kparams):
    """Plain-JAX reference replicating the kernel's exact (bf16-weight) math."""
    w_list = kparams["weights"]
    packed = kparams["packed"][0]
    segs = [(_B1_OFF, 256), (_B2_OFF, 512), (_B3_OFF, 256),
            (_B4_OFF, 128), (_B5_OFF, 128)]
    h = x.astype(jnp.float32)
    for w, (off, n) in zip(w_list, segs):
        b = packed[off:off + n]
        h = jnp.maximum(
            jnp.dot(h.astype(jnp.bfloat16), w,
                    preferred_element_type=jnp.float32) + b, 0.0)
    w6 = packed[_W6_OFF:_W6_OFF + 128]
    b6 = packed[_B6_OFF]
    return jnp.sum(h * w6, axis=-1, keepdims=True) + b6


def reference_forward_exact(x, params):
    """Full-precision reference with the original (unfolded) module semantics."""
    h = x
    for li, p in enumerate(params["layers"]):
        if li < 5:
            w, b, scale, shift = p
            h = jnp.maximum(h @ w + b, 0.0) * scale + shift
        else:
            w, b = p
            h = h @ w + b
    return h


if __name__ == "__main__":
    key = jax.random.PRNGKey(0)
    key, kx, kp = jax.random.split(key, 3)

    B = 16
    input_size = 32
    x = jax.random.normal(kx, (B, input_size), jnp.float32)
    params = init_params(input_size, kp)
    kparams = fold_params(params)

    out = jax.block_until_ready(neural_net_forward(x, kparams))
    assert out.shape == (B, 1)

    ref = reference_forward_bf16(x, kparams)
    assert jnp.allclose(out, ref, atol=2e-3, rtol=2e-3), \
        "mismatch vs bf16 reference"

    ref_exact = reference_forward_exact(x, params)
    assert jnp.allclose(out, ref_exact, atol=1e-1, rtol=1e-1), \
        "mismatch vs full-precision reference"

    print("KERNEL_OK")
</pallas_src>

<mosaic_0001>
module attributes {stable_mosaic.version = 11 : i64} {
  func.func @mlp_kernel(%arg0: i32, %arg1: memref<16x32xf32, #tpu.memory_space<vmem>>, %arg2: memref<32x256xbf16, #tpu.memory_space<vmem>>, %arg3: memref<256x512xbf16, #tpu.memory_space<vmem>>, %arg4: memref<512x256xbf16, #tpu.memory_space<vmem>>, %arg5: memref<256x128xbf16, #tpu.memory_space<vmem>>, %arg6: memref<128x128xbf16, #tpu.memory_space<vmem>>, %arg7: memref<1x1536xf32, #tpu.memory_space<vmem>>, %arg8: memref<1x1x16xf32, #tpu.memory_space<vmem>>) attributes {dimension_semantics = [#tpu.dimension_semantics<parallel>], iteration_bounds = array<i64: 1>, scalar_prefetch = 0 : i64, scratch_operands = 0 : i64, tpu.core_type = #tpu.core_type<tc>, window_params = [{transform_indices = @transform_0, window_bounds = array<i64: 16, 32>}, {pipeline_mode = #tpu.pipeline_mode<synchronous>, transform_indices = @transform_1, window_bounds = array<i64: 32, 256>}, {pipeline_mode = #tpu.pipeline_mode<synchronous>, transform_indices = @transform_2, window_bounds = array<i64: 256, 512>}, {pipeline_mode = #tpu.pipeline_mode<synchronous>, transform_indices = @transform_3, window_bounds = array<i64: 512, 256>}, {pipeline_mode = #tpu.pipeline_mode<synchronous>, transform_indices = @transform_4, window_bounds = array<i64: 256, 128>}, {pipeline_mode = #tpu.pipeline_mode<synchronous>, transform_indices = @transform_5, window_bounds = array<i64: 128, 128>}, {pipeline_mode = #tpu.pipeline_mode<synchronous>, transform_indices = @transform_6, window_bounds = array<i64: 1, 1536>}, {transform_indices = @transform_7, window_bounds = array<i64: 1, 1, 16>}]} {
    %c0 = arith.constant 0 : index
    %c0_0 = arith.constant 0 : index
    %0 = vector.load %arg1[%c0, %c0_0] : memref<16x32xf32, #tpu.memory_space<vmem>>, vector<16x32xf32>
    %1 = arith.truncf %0 : vector<16x32xf32> to vector<16x32xbf16>
    %c0_1 = arith.constant 0 : index
    %c0_2 = arith.constant 0 : index
    %2 = vector.load %arg7[%c0_1, %c0_2] : memref<1x1536xf32, #tpu.memory_space<vmem>>, vector<1x256xf32>
    %c0_3 = arith.constant 0 : index
    %c0_4 = arith.constant 0 : index
    %3 = vector.load %arg2[%c0_3, %c0_4] : memref<32x256xbf16, #tpu.memory_space<vmem>>, vector<32x256xbf16>
    %cst = arith.constant dense<0.000000e+00> : vector<16x256xf32>
    %4 = tpu.matmul %1, %3, %cst {dimension_numbers = #tpu.dot_dimension_numbers<[1], [0], [0], [1], [0, 0, 1, 1], [], []>} : vector<16x32xbf16>, vector<32x256xbf16>, vector<16x256xf32> -> vector<16x256xf32>
    %5 = vector.broadcast %2 : vector<1x256xf32> to vector<16x256xf32>
    %6 = arith.addf %4, %5 : vector<16x256xf32>
    %cst_5 = arith.constant 0.000000e+00 : f32
    %7 = vector.broadcast %cst_5 : f32 to vector<16x256xf32>
    %8 = arith.maximumf %6, %7 : vector<16x256xf32>
    %9 = arith.truncf %8 : vector<16x256xf32> to vector<16x256xbf16>
    %c0_6 = arith.constant 0 : index
    %c256 = arith.constant 256 : index
    %10 = vector.load %arg7[%c0_6, %c256] : memref<1x1536xf32, #tpu.memory_space<vmem>>, vector<1x512xf32>
    %c0_7 = arith.constant 0 : index
    %c0_8 = arith.constant 0 : index
    %11 = vector.load %arg3[%c0_7, %c0_8] : memref<256x512xbf16, #tpu.memory_space<vmem>>, vector<256x512xbf16>
    %cst_9 = arith.constant dense<0.000000e+00> : vector<16x512xf32>
    %12 = tpu.matmul %9, %11, %cst_9 {dimension_numbers = #tpu.dot_dimension_numbers<[1], [0], [0], [1], [0, 0, 1, 1], [], []>} : vector<16x256xbf16>, vector<256x512xbf16>, vector<16x512xf32> -> vector<16x512xf32>
    %13 = vector.broadcast %10 : vector<1x512xf32> to vector<16x512xf32>
    %14 = arith.addf %12, %13 : vector<16x512xf32>
    %cst_10 = arith.constant 0.000000e+00 : f32
    %15 = vector.broadcast %cst_10 : f32 to vector<16x512xf32>
    %16 = arith.maximumf %14, %15 : vector<16x512xf32>
    %17 = arith.truncf %16 : vector<16x512xf32> to vector<16x512xbf16>
    %c0_11 = arith.constant 0 : index
    %c768 = arith.constant 768 : index
    %18 = vector.load %arg7[%c0_11, %c768] : memref<1x1536xf32, #tpu.memory_space<vmem>>, vector<1x256xf32>
    %c0_12 = arith.constant 0 : index
    %c0_13 = arith.constant 0 : index
    %19 = vector.load %arg4[%c0_12, %c0_13] : memref<512x256xbf16, #tpu.memory_space<vmem>>, vector<512x256xbf16>
    %cst_14 = arith.constant dense<0.000000e+00> : vector<16x256xf32>
    %20 = tpu.matmul %17, %19, %cst_14 {dimension_numbers = #tpu.dot_dimension_numbers<[1], [0], [0], [1], [0, 0, 1, 1], [], []>} : vector<16x512xbf16>, vector<512x256xbf16>, vector<16x256xf32> -> vector<16x256xf32>
    %21 = vector.broadcast %18 : vector<1x256xf32> to vector<16x256xf32>
    %22 = arith.addf %20, %21 : vector<16x256xf32>
    %cst_15 = arith.constant 0.000000e+00 : f32
    %23 = vector.broadcast %cst_15 : f32 to vector<16x256xf32>
    %24 = arith.maximumf %22, %23 : vector<16x256xf32>
    %25 = arith.truncf %24 : vector<16x256xf32> to vector<16x256xbf16>
    %c0_16 = arith.constant 0 : index
    %c1024 = arith.constant 1024 : index
    %26 = vector.load %arg7[%c0_16, %c1024] : memref<1x1536xf32, #tpu.memory_space<vmem>>, vector<1x128xf32>
    %c0_17 = arith.constant 0 : index
    %c0_18 = arith.constant 0 : index
    %27 = vector.load %arg5[%c0_17, %c0_18] : memref<256x128xbf16, #tpu.memory_space<vmem>>, vector<256x128xbf16>
    %cst_19 = arith.constant dense<0.000000e+00> : vector<16x128xf32>
    %28 = tpu.matmul %25, %27, %cst_19 {dimension_numbers = #tpu.dot_dimension_numbers<[1], [0], [0], [1], [0, 0, 1, 1], [], []>} : vector<16x256xbf16>, vector<256x128xbf16>, vector<16x128xf32> -> vector<16x128xf32>
    %29 = vector.broadcast %26 : vector<1x128xf32> to vector<16x128xf32>
    %30 = arith.addf %28, %29 : vector<16x128xf32>
    %cst_20 = arith.constant 0.000000e+00 : f32
    %31 = vector.broadcast %cst_20 : f32 to vector<16x128xf32>
    %32 = arith.maximumf %30, %31 : vector<16x128xf32>
    %33 = arith.truncf %32 : vector<16x128xf32> to vector<16x128xbf16>
    %c0_21 = arith.constant 0 : index
    %c1152 = arith.constant 1152 : index
    %34 = vector.load %arg7[%c0_21, %c1152] : memref<1x1536xf32, #tpu.memory_space<vmem>>, vector<1x128xf32>
    %c0_22 = arith.constant 0 : index
    %c0_23 = arith.constant 0 : index
    %35 = vector.load %arg6[%c0_22, %c0_23] : memref<128x128xbf16, #tpu.memory_space<vmem>>, vector<128x128xbf16>
    %cst_24 = arith.constant dense<0.000000e+00> : vector<16x128xf32>
    %36 = tpu.matmul %33, %35, %cst_24 {dimension_numbers = #tpu.dot_dimension_numbers<[1], [0], [0], [1], [0, 0, 1, 1], [], []>} : vector<16x128xbf16>, vector<128x128xbf16>, vector<16x128xf32> -> vector<16x128xf32>
    %37 = vector.broadcast %34 : vector<1x128xf32> to vector<16x128xf32>
    %38 = arith.addf %36, %37 : vector<16x128xf32>
    %cst_25 = arith.constant 0.000000e+00 : f32
    %39 = vector.broadcast %cst_25 : f32 to vector<16x128xf32>
    %40 = arith.maximumf %38, %39 : vector<16x128xf32>
    %c0_26 = arith.constant 0 : index
    %c1280 = arith.constant 1280 : index
    %41 = vector.load %arg7[%c0_26, %c1280] : memref<1x1536xf32, #tpu.memory_space<vmem>>, vector<1x128xf32>
    %c0_27 = arith.constant 0 : index
    %c1408 = arith.constant 1408 : index
    %42 = vector.load %arg7[%c0_27, %c1408] : memref<1x1536xf32, #tpu.memory_space<vmem>>, vector<1x1xf32>
    %cst_28 = arith.constant dense<0.000000e+00> : vector<1x16xf32>
    %43 = tpu.matmul %41, %40, %cst_28 {dimension_numbers = #tpu.dot_dimension_numbers<[1], [1], [0], [0], [0, 0, 1, 0], [], []>} : vector<1x128xf32>, vector<16x128xf32>, vector<1x16xf32> -> vector<1x16xf32>
    %44 = vector.broadcast %42 : vector<1x1xf32> to vector<1x16xf32>
    %45 = arith.addf %43, %44 : vector<1x16xf32>
    %46 = vector.shape_cast %45 : vector<1x16xf32> to vector<1x1x16xf32>
    %c0_29 = arith.constant 0 : index
    %c0_30 = arith.constant 0 : index
    %c0_31 = arith.constant 0 : index
    %47 = vector.load %arg8[%c0_29, %c0_30, %c0_31] : memref<1x1x16xf32, #tpu.memory_space<vmem>>, vector<1x1x16xf32>
    tpu.vector_store %arg8[%c0_29, %c0_30, %c0_31], %46 {strides = array<i32>} : memref<1x1x16xf32, #tpu.memory_space<vmem>>, vector<1x1x16xf32>,
    return
  }
  func.func @transform_0(%arg0: i32) -> (i32, i32) {
    %c0_i32 = arith.constant 0 : i32
    %c0_i32_0 = arith.constant 0 : i32
    return %arg0, %c0_i32 : i32, i32
  }
  func.func @transform_1(%arg0: i32) -> (i32, i32) {
    %c0_i32 = arith.constant 0 : i32
    %c0_i32_0 = arith.constant 0 : i32
    %c0_i32_1 = arith.constant 0 : i32
    return %c0_i32, %c0_i32_0 : i32, i32
  }
  func.func @transform_2(%arg0: i32) -> (i32, i32) {
    %c0_i32 = arith.constant 0 : i32
    %c0_i32_0 = arith.constant 0 : i32
    %c0_i32_1 = arith.constant 0 : i32
    return %c0_i32, %c0_i32_0 : i32, i32
  }
  func.func @transform_3(%arg0: i32) -> (i32, i32) {
    %c0_i32 = arith.constant 0 : i32
    %c0_i32_0 = arith.constant 0 : i32
    %c0_i32_1 = arith.constant 0 : i32
    return %c0_i32, %c0_i32_0 : i32, i32
  }
  func.func @transform_4(%arg0: i32) -> (i32, i32) {
    %c0_i32 = arith.constant 0 : i32
    %c0_i32_0 = arith.constant 0 : i32
    %c0_i32_1 = arith.constant 0 : i32
    return %c0_i32, %c0_i32_0 : i32, i32
  }
  func.func @transform_5(%arg0: i32) -> (i32, i32) {
    %c0_i32 = arith.constant 0 : i32
    %c0_i32_0 = arith.constant 0 : i32
    %c0_i32_1 = arith.constant 0 : i32
    return %c0_i32, %c0_i32_0 : i32, i32
  }
  func.func @transform_6(%arg0: i32) -> (i32, i32) {
    %c0_i32 = arith.constant 0 : i32
    %c0_i32_0 = arith.constant 0 : i32
    %c0_i32_1 = arith.constant 0 : i32
    return %c0_i32, %c0_i32_0 : i32, i32
  }
  func.func @transform_7(%arg0: i32) -> (i32, i32, i32) {
    %c0_i32 = arith.constant 0 : i32
    %c0_i32_0 = arith.constant 0 : i32
    %c0_i32_1 = arith.constant 0 : i32
    return %arg0, %c0_i32, %c0_i32_0 : i32, i32, i32
  }
}

</mosaic_0001>

<bundles_post_ra>
// kernel: tpu_custom_call.1
= control target key start
LH: loop header
LB: loop body
LE: loop exit
PB: predicated region body
PF: predicated region fallthrough
CT: control target
= control target key end

     0   :  { %12 = vsyncpa [#allocation3], 0  ;;  %s2622_s0 = inlined_call_operand.hbm [shape: f32[16,32], index: 0, kind: input, shape index: {}]   ;;  %s2623_s1 = inlined_call_operand.hbm [shape: bf16[32,256], index: 1, kind: input, shape index: {}]   ;;  %s2624_s2 = inlined_call_operand.hbm [shape: bf16[256,512], index: 2, kind: input, shape index: {}]   ;;  %s2625_s3 = inlined_call_operand.hbm [shape: bf16[512,256], index: 3, kind: input, shape index: {}]   ;;  %s2626_s4 = inlined_call_operand.hbm [shape: bf16[256,128], index: 4, kind: input, shape index: {}]   ;;  %s2627_s5 = inlined_call_operand.hbm [shape: bf16[128,128], index: 5, kind: input, shape index: {}]   ;;  %s2628_s6 = inlined_call_operand.hbm [shape: f32[1,1536], index: 6, kind: input, shape index: {}]   ;;  %s2629_s7 = inlined_call_operand.hbm [shape: f32[1,1,16], index: 7, kind: output, shape index: {}]  }
   0x1   :  { %13 = vsyncpa [#allocation6], 0 }
   0x2   :  { %14 = vsyncpa [#allocation9], 0 }
   0x3   :  { %15 = vsyncpa [#allocation12], 0 }
   0x4   :  { %16 = vsyncpa [#allocation4], 0  ;;  %s34_s26 = sshll.u32 %s2623_s1, 4  ;;  %s2531_s27 = smov [#allocation5]   ;;  %s35_s26 = int_to_ptr.hbm [resolvable:$true] %s34_s26 }
   0x5   :  { %s36_s28 = sshll.u32 %s2531_s27, 4  ;;  %s60_s8 = sshll.u32 %s2625_s3, 4  ;;  %s37_s28 = int_to_ptr.vmem [resolvable:$true] %s36_s28  ;;  %s61_s8 = int_to_ptr.hbm [resolvable:$true] %s60_s8 }
   0x6   :  { %s2532_s9 = smov 128   ;;  %s2533_s10 = smov 8  }
   0x7   :  { %42 = dma.hbm_to_vmem [thread:$0]  %s35_s26, 512, %s37_s28, [#allocation6], %s2532_s9, %s2532_s9, %s2533_s10  }
   0x8   :  { %s2534_s11 = smov [#allocation8]   ;;  %s86_s1 = sshll.u32 %s2627_s5, 4  ;;  %s87_s1 = int_to_ptr.hbm [resolvable:$true] %s86_s1 }
   0x9   :  { %s62_s12 = sshll.u32 %s2534_s11, 4  ;;  %s2535_s15 = smov [#allocation11]   ;;  %s63_s12 = int_to_ptr.vmem [resolvable:$true] %s62_s12 }
   0xa   :  { %68 = dma.hbm_to_vmem [thread:$0]  %s61_s8, 8192, %s63_s12, [#allocation9], %s2532_s9, %s2532_s9, %s2533_s10  }
   0xb   :  { %s88_s16 = sshll.u32 %s2535_s15, 4  ;;  %s21_s3 = sshll.u32 %s2622_s0, 4  ;;  %s89_s16 = int_to_ptr.vmem [resolvable:$true] %s88_s16  ;;  %s22_s3 = int_to_ptr.hbm [resolvable:$true] %s21_s3 }
   0xc   :  { %s2536_s19 = smov 64   ;;  %s2537_s20 = smov 4  }
   0xd   :  { %94 = dma.hbm_to_vmem [thread:$0]  %s87_s1, 1024, %s89_s16, [#allocation12], %s2536_s19, %s2536_s19, %s2537_s20  }
   0xe   :  { %s2538_s21 = smov [#allocation2]   ;;  %s47_s25 = sshll.u32 %s2624_s2, 4  ;;  %s48_s25 = int_to_ptr.hbm [resolvable:$true] %s47_s25 }
   0xf   :  { %s23_s22 = sshll.u32 %s2538_s21, 4  ;;  %s2539_s5 = smov [#allocation7]   ;;  %s24_s22 = int_to_ptr.vmem [resolvable:$true] %s23_s22 }
  0x10   :  { %29 = dma.hbm_to_vmem [thread:$0]  %s22_s3, 256, %s24_s22, [#allocation3], %s2532_s9, %s2532_s9, %s2533_s10  }
  0x11   :  { %s49_s26 = sshll.u32 %s2539_s5, 4  ;;  %s73_s0 = sshll.u32 %s2626_s4, 4  ;;  %s50_s26 = int_to_ptr.vmem [resolvable:$true] %s49_s26  ;;  %s74_s0 = int_to_ptr.hbm [resolvable:$true] %s73_s0 }
  0x12   :  { %s2540_s29 = smov 256   ;;  %s2541_s30 = smov 16  }
  0x13   :  { %55 = dma.hbm_to_vmem [thread:$0]  %s48_s25, 8192, %s50_s26, [#allocation6], %s2540_s29, %s2540_s29, %s2541_s30  }
  0x14   :  { %s2542_s8 = smov [#allocation10]   ;;  %s100_s2 = sshll.u32 %s2628_s6, 4  ;;  %s101_s2 = int_to_ptr.hbm [resolvable:$true] %s100_s2 }
  0x15   :  { %s75_s11 = sshll.u32 %s2542_s8, 4  ;;  %s2543_s9 = smov [#allocation13]   ;;  %s76_s11 = int_to_ptr.vmem [resolvable:$true] %s75_s11 }
  0x16   :  { %81 = dma.hbm_to_vmem [thread:$0]  %s74_s0, 2048, %s76_s11, [#allocation9], %s2536_s19, %s2536_s19, %s2537_s20  }
  0x17   :  { %s102_s10 = sshll.u32 %s2543_s9, 4  ;;  %s103_s10 = int_to_ptr.vmem [resolvable:$true] %s102_s10 }
  0x18   :  { %105 = dma.hbm_to_vmem [thread:$0]  %s101_s2, 192, %s103_s10, [#allocation12]  }
  0x19   :  { %2521 = dma.done.wait [#allocation3], 256  }
  0x1a   :  { %2522 = vsyncadd [#allocation3], 4294967040 }
  0x1b   :  { %2523 = dma.done.wait [#allocation6], 8704  }
  0x1c   :  { %2524 = vsyncadd [#allocation6], 4294958592 }
  0x1d   :  { %2525 = dma.done.wait [#allocation9], 10240  }
  0x1e   :  { %2526 = vsyncadd [#allocation9], 4294957056 }
  0x1f   :  { %2527 = dma.done.wait [#allocation12], 1216  }
  0x20   :  { %2528 = vsyncadd [#allocation12], 4294966080  ;;  %v1539_v0 = vld [vmem:[#allocation5 + $0x10] sm:$0xf]  ;;  %v2158_v1 = vld [vmem:[#allocation5 + $0x14] sm:$0xf0] }
  0x21   :  { %v1531_v2 = vld [vmem:[#allocation5] sm:$0xf]  ;;  %v1540_v3 = vor.u32 %v2158_v1, %v1539_v0  ;;  %v2156_v4 = vld [vmem:[#allocation5 + $0x4] sm:$0xf0]  ;;  %v135_v5 = vld [vmem:[#allocation2] sm:$0xff]  ;;  %vm168_vm0 = vcmask 261120  }
  0x22   :  { %v136_v6 = vld [vmem:[#allocation2 + $0x8] sm:$0xff]  ;;  %v2157_v7 = vld [vmem:[#allocation5 + $0x14] sm:$0xf]  ;;  %v1532_v9 = vor.u32 %v2156_v4, %v1531_v2  ;;  %v2155_v10 = vld [vmem:[#allocation5 + $0x4] sm:$0xf]  ;;  %s2545_s4 = smov [#allocation14]  }
  0x23   :  { %v1541_v8 = vld [vmem:[#allocation5 + $0x18] sm:$0xf0]  ;;  %178 = vmatpush.bf16.msra.mxu1 %v1540_v3  ;;  %v1533_v11 = vld [vmem:[#allocation5 + $0x8] sm:$0xf0]  ;;  %v1661_v12 = vld [vmem:[#allocation7 + $0xe0] sm:$0xf]  ;;  %v2607_v23 = vpack.c.bf16 %v136_v6, %v135_v5 }
  0x24   :  { %v2189_v13 = vld [vmem:[#allocation7 + $0xec] sm:$0xf0]  ;;  %v1544_v14 = vor.u32 %v2157_v7, %v1541_v8  ;;  %v2187_v16 = vld [vmem:[#allocation7 + $0xe4] sm:$0xf]  ;;  %v1663_v17 = vld [vmem:[#allocation7 + $0xf0] sm:$0xf0]  ;;  %v1536_v28 = vor.u32 %v2155_v10, %v1533_v11 }
  0x25   :  { %v1662_v15 = vor.u32 %v2189_v13, %v1661_v12  ;;  %v1645_v18 = vld [vmem:[#allocation7 + $0xc0] sm:$0xf]  ;;  %v1666_v19 = vor.u32 %v2187_v16, %v1663_v17  ;;  %v2185_v20 = vld [vmem:[#allocation7 + $0xcc] sm:$0xf0]  ;;  %v2183_v21 = vld [vmem:[#allocation7 + $0xc4] sm:$0xf] }
  0x26   :  { %v1647_v22 = vld [vmem:[#allocation7 + $0xd0] sm:$0xf0]  ;;  %v1646_v24 = vor.u32 %v2185_v20, %v1645_v18  ;;  %v1629_v26 = vld [vmem:[#allocation7 + $0xa0] sm:$0xf]  ;;  %v2181_v27 = vld [vmem:[#allocation7 + $0xac] sm:$0xf0] }
  0x27   :  { %600 = vmatpush.bf16.msra.mxu2 %v1662_v15  ;;  %179 = vmatpush.bf16.msra.mxu1 %v1532_v9  ;;  %v1650_v25 = vor.u32 %v2183_v21, %v1647_v22  ;;  %v2179_v29 = vld [vmem:[#allocation7 + $0xa4] sm:$0xf]  ;;  %v1631_v30 = vld [vmem:[#allocation7 + $0xb0] sm:$0xf0]  ;;  %v1789_v31 = vld [vmem:[#allocation7 + $0x1e0] sm:$0xf]  ;;  %v1630_v33 = vor.u32 %v2181_v27, %v1629_v26 }
  0x28   :  { %628 = vmatpush.bf16.msra.mxu0 %v1666_v19  ;;  %v2221_v32 = vld [vmem:[#allocation7 + $0x1ec] sm:$0xf0]  ;;  %v1613_v34 = vld [vmem:[#allocation7 + $0x80] sm:$0xf]  ;;  %v2219_v36 = vld [vmem:[#allocation7 + $0x1e4] sm:$0xf]  ;;  %v1634_v37 = vor.u32 %v2179_v29, %v1631_v30 }
  0x29   :  { %v1790_v35 = vor.u32 %v2221_v32, %v1789_v31  ;;  %v2177_v38 = vld [vmem:[#allocation7 + $0x8c] sm:$0xf0]  ;;  %v2175_v39 = vld [vmem:[#allocation7 + $0x84] sm:$0xf]  ;;  %v1791_v40 = vld [vmem:[#allocation7 + $0x1f0] sm:$0xf0] }
  0x2a   :  { %1545 = vmatmul.msk.bf16.vlgmr.msra.gmra.mxu1 %vm168_vm0, %v2607_v23  ;;  %v1615_v41 = vld [vmem:[#allocation7 + $0x90] sm:$0xf0]  ;;  %v1794_v42 = vor.u32 %v2219_v36, %v1791_v40  ;;  %v1773_v43 = vld [vmem:[#allocation7 + $0x1c0] sm:$0xf]  ;;  %v2217_v44 = vld [vmem:[#allocation7 + $0x1cc] sm:$0xf0]  ;;  %v1614_v48 = vor.u32 %v2177_v38, %v1613_v34 }
  0x2b   :  { %192 = vmatpush.bf16.msrb.mxu1 %v1544_v14  ;;  %601 = vmatpush.bf16.msra.mxu2 %v1646_v24  ;;  %v1774_v45 = vor.u32 %v2217_v44, %v1773_v43  ;;  %v2215_v46 = vld [vmem:[#allocation7 + $0x1c4] sm:$0xf]  ;;  %v1775_v47 = vld [vmem:[#allocation7 + $0x1d0] sm:$0xf0]  ;;  %v1597_v49 = vld [vmem:[#allocation7 + $0x60] sm:$0xf]  ;;  %v1618_v52 = vor.u32 %v2175_v39, %v1615_v41 }
  0x2c   :  { %629 = vmatpush.bf16.msra.mxu0 %v1650_v25  ;;  %614 = vmatpush.bf16.msra.mxu3 %v1790_v35  ;;  %v1778_v50 = vor.u32 %v2215_v46, %v1775_v47  ;;  %v1757_v51 = vld [vmem:[#allocation7 + $0x1a0] sm:$0xf]  ;;  %v2173_v53 = vld [vmem:[#allocation7 + $0x6c] sm:$0xf0]  ;;  %v2171_v54 = vld [vmem:[#allocation7 + $0x64] sm:$0xf] }
  0x2d   :  { %v2213_v55 = vld [vmem:[#allocation7 + $0x1ac] sm:$0xf0]  ;;  %v1599_v56 = vld [vmem:[#allocation7 + $0x70] sm:$0xf0]  ;;  %v2211_v58 = vld [vmem:[#allocation7 + $0x1a4] sm:$0xf]  ;;  %v1598_v62 = vor.u32 %v2173_v53, %v1597_v49 }
  0x2e   :  { %v1758_v57 = vor.u32 %v2213_v55, %v1757_v51  ;;  %v1759_v59 = vld [vmem:[#allocation7 + $0x1b0] sm:$0xf0]  ;;  %v1741_v60 = vld [vmem:[#allocation7 + $0x180] sm:$0xf]  ;;  %v2209_v61 = vld [vmem:[#allocation7 + $0x18c] sm:$0xf0]  ;;  %v1602_v2 = vor.u32 %v2171_v54, %v1599_v56 }
  0x2f   :  { %193 = vmatpush.bf16.msrb.mxu1 %v1536_v28  ;;  %602 = vmatpush.bf16.msra.mxu2 %v1630_v33  ;;  %v1581_v63 = vld [vmem:[#allocation7 + $0x40] sm:$0xf]  ;;  %v2169_v0 = vld [vmem:[#allocation7 + $0x4c] sm:$0xf0]  ;;  %v1762_v1 = vor.u32 %v2211_v58, %v1759_v59  ;;  %v2167_v3 = vld [vmem:[#allocation7 + $0x44] sm:$0xf]  ;;  %v1742_v5 = vor.u32 %v2209_v61, %v1741_v60 }
  0x30   :  { %630 = vmatpush.bf16.msra.mxu0 %v1634_v37  ;;  %615 = vmatpush.bf16.msra.mxu3 %v1774_v45  ;;  %v1583_v4 = vld [vmem:[#allocation7 + $0x50] sm:$0xf0]  ;;  %v2207_v6 = vld [vmem:[#allocation7 + $0x184] sm:$0xf]  ;;  %v1582_v8 = vor.u32 %v2169_v0, %v1581_v63  ;;  %v1565_v10 = vld [vmem:[#allocation7 + $0x20] sm:$0xf] }
  0x31   :  { %v1743_v7 = vld [vmem:[#allocation7 + $0x190] sm:$0xf0]  ;;  %v1586_v9 = vor.u32 %v2167_v3, %v1583_v4  ;;  %v2165_v11 = vld [vmem:[#allocation7 + $0x2c] sm:$0xf0]  ;;  %v2163_v13 = vld [vmem:[#allocation7 + $0x24] sm:$0xf] }
  0x32   :  { %v1746_v12 = vor.u32 %v2207_v6, %v1743_v7  ;;  %v1567_v14 = vld [vmem:[#allocation7 + $0x30] sm:$0xf0]  ;;  %v1566_v15 = vor.u32 %v2165_v11, %v1565_v10  ;;  %v1549_v17 = vld [vmem:[#allocation7] sm:$0xf]  ;;  %v2161_v18 = vld [vmem:[#allocation7 + $0xc] sm:$0xf0] }
  0x33   :  { %642 = vmatpush.bf16.msra.mxu1 %v1794_v42  ;;  %603 = vmatpush.bf16.msra.mxu2 %v1614_v48  ;;  %v1570_v16 = vor.u32 %v2163_v13, %v1567_v14  ;;  %v2159_v19 = vld [vmem:[#allocation7 + $0x4] sm:$0xf]  ;;  %v1551_v20 = vld [vmem:[#allocation7 + $0x10] sm:$0xf0]  ;;  %v1550_v21 = vor.u32 %v2161_v18, %v1549_v17  ;;  %v1669_v24 = vld [vmem:[#allocation7 + $0xe8] sm:$0xf] }
  0x34   :  { %631 = vmatpush.bf16.msra.mxu0 %v1618_v52  ;;  %616 = vmatpush.bf16.msra.mxu3 %v1758_v57  ;;  %v1554_v22 = vor.u32 %v2159_v19, %v1551_v20  ;;  %v2190_v25 = vld [vmem:[#allocation7 + $0xf4] sm:$0xf0]  ;;  %v2188_v26 = vld [vmem:[#allocation7 + $0xec] sm:$0xf]  ;;  %v1725_v29 = vld [vmem:[#allocation7 + $0x160] sm:$0xf] }
  0x35   :  { %v1670_v27 = vor.u32 %v2190_v25, %v1669_v24  ;;  %v2205_v30 = vld [vmem:[#allocation7 + $0x16c] sm:$0xf0]  ;;  %v2203_v31 = vld [vmem:[#allocation7 + $0x164] sm:$0xf]  ;;  %v1727_v33 = vld [vmem:[#allocation7 + $0x170] sm:$0xf0] }
  0x36   :  { %v1726_v32 = vor.u32 %v2205_v30, %v1725_v29  ;;  %v1653_v34 = vld [vmem:[#allocation7 + $0xc8] sm:$0xf]  ;;  %v2186_v35 = vld [vmem:[#allocation7 + $0xd4] sm:$0xf0]  ;;  %v1730_v36 = vor.u32 %v2203_v31, %v1727_v33  ;;  %v2184_v38 = vld [vmem:[#allocation7 + $0xcc] sm:$0xf] }
  0x37   :  { %643 = vmatpush.bf16.msra.mxu1 %v1778_v50  ;;  %604 = vmatpush.bf16.msra.mxu2 %v1598_v62  ;;  %v1654_v37 = vor.u32 %v2186_v35, %v1653_v34  ;;  %v1655_v39 = vld [vmem:[#allocation7 + $0xd8] sm:$0xf0]  ;;  %v1709_v41 = vld [vmem:[#allocation7 + $0x140] sm:$0xf]  ;;  %v2201_v42 = vld [vmem:[#allocation7 + $0x14c] sm:$0xf0] }
  0x38   :  { %632 = vmatpush.bf16.msra.mxu0 %v1602_v2  ;;  %617 = vmatpush.bf16.msra.mxu3 %v1742_v5  ;;  %v1658_v40 = vor.u32 %v2184_v38, %v1655_v39  ;;  %v2199_v43 = vld [vmem:[#allocation7 + $0x144] sm:$0xf]  ;;  %v1710_v44 = vor.u32 %v2201_v42, %v1709_v41  ;;  %v1711_v45 = vld [vmem:[#allocation7 + $0x150] sm:$0xf0]  ;;  %v1637_v47 = vld [vmem:[#allocation7 + $0xa8] sm:$0xf] }
  0x39   :  { %v1714_v46 = vor.u32 %v2199_v43, %v1711_v45  ;;  %v2182_v48 = vld [vmem:[#allocation7 + $0xb4] sm:$0xf0]  ;;  %v2180_v49 = vld [vmem:[#allocation7 + $0xac] sm:$0xf]  ;;  %v1639_v51 = vld [vmem:[#allocation7 + $0xb8] sm:$0xf0] }
  0x3a   :  { %1546 = vmatmul.msk.bf16.vlgmr.msrb.gmra.mxu1 %vm168_vm0, %v2607_v23  ;;  %v1671_v23 = vld [vmem:[#allocation7 + $0xf8] sm:$0xf0]  ;;  %v1638_v50 = vor.u32 %v2182_v48, %v1637_v47  ;;  %v1642_v52 = vor.u32 %v2180_v49, %v1639_v51  ;;  %v1693_v53 = vld [vmem:[#allocation7 + $0x120] sm:$0xf]  ;;  %v2197_v54 = vld [vmem:[#allocation7 + $0x12c] sm:$0xf0] }
  0x3b   :  { %644 = vmatpush.bf16.msra.mxu1 %v1762_v1  ;;  %605 = vmatpush.bf16.msra.mxu2 %v1582_v8  ;;  %v1674_v28 = vor.u32 %v2188_v26, %v1671_v23  ;;  %v2195_v55 = vld [vmem:[#allocation7 + $0x124] sm:$0xf]  ;;  %v1694_v56 = vor.u32 %v2197_v54, %v1693_v53  ;;  %v1695_v57 = vld [vmem:[#allocation7 + $0x130] sm:$0xf0]  ;;  %v1621_v58 = vld [vmem:[#allocation7 + $0x88] sm:$0xf] }
  0x3c   :  { %633 = vmatpush.bf16.msra.mxu0 %v1586_v9  ;;  %618 = vmatpush.bf16.msra.mxu3 %v1726_v32  ;;  %v2178_v59 = vld [vmem:[#allocation7 + $0x94] sm:$0xf0]  ;;  %v1698_v60 = vor.u32 %v2195_v55, %v1695_v57  ;;  %v2176_v62 = vld [vmem:[#allocation7 + $0x8c] sm:$0xf]  ;;  %v1623_v63 = vld [vmem:[#allocation7 + $0x98] sm:$0xf0] }
  0x3d   :  { %v1622_v61 = vor.u32 %v2178_v59, %v1621_v58  ;;  %v1626_v0 = vor.u32 %v2176_v62, %v1623_v63  ;;  %v1677_v1 = vld [vmem:[#allocation7 + $0x100] sm:$0xf]  ;;  %v2193_v2 = vld [vmem:[#allocation7 + $0x10c] sm:$0xf0]  ;;  %v2191_v3 = vld [vmem:[#allocation7 + $0x104] sm:$0xf] }
  0x3e   :  { %v1678_v4 = vor.u32 %v2193_v2, %v1677_v1  ;;  %v1679_v5 = vld [vmem:[#allocation7 + $0x110] sm:$0xf0]  ;;  %v1605_v6 = vld [vmem:[#allocation7 + $0x68] sm:$0xf]  ;;  %v2174_v7 = vld [vmem:[#allocation7 + $0x74] sm:$0xf0] }
  0x3f   :  { %645 = vmatpush.bf16.msra.mxu1 %v1746_v12  ;;  %606 = vmatpush.bf16.msra.mxu2 %v1566_v15  ;;  %v1682_v8 = vor.u32 %v2191_v3, %v1679_v5  ;;  %v1606_v9 = vor.u32 %v2174_v7, %v1605_v6  ;;  %v1797_v10 = vld [vmem:[#allocation7 + $0x1e8] sm:$0xf]  ;;  %v2222_v11 = vld [vmem:[#allocation7 + $0x1f4] sm:$0xf0]  ;;  %v2172_v12 = vld [vmem:[#allocation7 + $0x6c] sm:$0xf] }
  0x40   :  { %634 = vmatpush.bf16.msra.mxu0 %v1570_v16  ;;  %619 = vmatpush.bf16.msra.mxu3 %v1710_v44  ;;  %v1798_v13 = vor.u32 %v2222_v11, %v1797_v10  ;;  %v1607_v14 = vld [vmem:[#allocation7 + $0x78] sm:$0xf0]  ;;  %v2220_v15 = vld [vmem:[#allocation7 + $0x1ec] sm:$0xf]  ;;  %v1589_v19 = vld [vmem:[#allocation7 + $0x48] sm:$0xf] }
  0x41   :  { %v1610_v16 = vor.u32 %v2172_v12, %v1607_v14  ;;  %v1799_v17 = vld [vmem:[#allocation7 + $0x1f8] sm:$0xf0]  ;;  %v2170_v20 = vld [vmem:[#allocation7 + $0x54] sm:$0xf0]  ;;  %v2168_v25 = vld [vmem:[#allocation7 + $0x4c] sm:$0xf] }
  0x42   :  { %v1802_v18 = vor.u32 %v2220_v15, %v1799_v17  ;;  %v2218_v24 = vld [vmem:[#allocation7 + $0x1d4] sm:$0xf0]  ;;  %v1591_v26 = vld [vmem:[#allocation7 + $0x58] sm:$0xf0]  ;;  %v1573_v31 = vld [vmem:[#allocation7 + $0x28] sm:$0xf] }
  0x43   :  { %607 = vmatpush.bf16.msra.mxu2 %v1550_v21  ;;  %646 = vmatpush.bf16.msra.mxu1 %v1730_v36  ;;  %v1781_v21 = vld [vmem:[#allocation7 + $0x1c8] sm:$0xf]  ;;  %v1594_v23 = vor.u32 %v2168_v25, %v1591_v26  ;;  %v1783_v29 = vld [vmem:[#allocation7 + $0x1d8] sm:$0xf0]  ;;  %v2166_v32 = vld [vmem:[#allocation7 + $0x34] sm:$0xf0] }
  0x44   :  { %635 = vmatpush.bf16.msra.mxu0 %v1554_v22  ;;  %620 = vmatpush.bf16.msra.mxu3 %v1694_v56  ;;  %v1590_v22 = vor.u32 %v2170_v20, %v1589_v19  ;;  %v1765_v33 = vld [vmem:[#allocation7 + $0x1a8] sm:$0xf]  ;;  %v1574_v34 = vor.u32 %v2166_v32, %v1573_v31  ;;  %v2214_v35 = vld [vmem:[#allocation7 + $0x1b4] sm:$0xf0]  ;;  %v2164_v36 = vld [vmem:[#allocation7 + $0x2c] sm:$0xf] }
  0x45   :  { %v1766_v38 = vor.u32 %v2214_v35, %v1765_v33  ;;  %v1767_v41 = vld [vmem:[#allocation7 + $0x1b8] sm:$0xf0]  ;;  %v1557_v43 = vld [vmem:[#allocation7 + $0x8] sm:$0xf]  ;;  %v2162_v44 = vld [vmem:[#allocation7 + $0x14] sm:$0xf0] }
  0x46   :  { %v1749_v45 = vld [vmem:[#allocation7 + $0x188] sm:$0xf]  ;;  %v2210_v47 = vld [vmem:[#allocation7 + $0x194] sm:$0xf0]  ;;  %v2160_v48 = vld [vmem:[#allocation7 + $0xc] sm:$0xf] }
  0x47   :  { %656 = vmatpush.bf16.msrb.mxu2 %v1670_v27  ;;  %647 = vmatpush.bf16.msra.mxu1 %v1714_v46  ;;  %v1782_v27 = vor.u32 %v2218_v24, %v1781_v21  ;;  %v1558_v46 = vor.u32 %v2162_v44, %v1557_v43  ;;  %v1559_v49 = vld [vmem:[#allocation7 + $0x18] sm:$0xf0]  ;;  %v1733_v55 = vld [vmem:[#allocation7 + $0x168] sm:$0xf]  ;;  %v2206_v56 = vld [vmem:[#allocation7 + $0x174] sm:$0xf0] }
  0x48   :  { %684 = vmatpush.bf16.msrb.mxu0 %v1674_v28  ;;  %621 = vmatpush.bf16.msra.mxu3 %v1678_v4  ;;  %v2216_v28 = vld [vmem:[#allocation7 + $0x1cc] sm:$0xf]  ;;  %v1562_v51 = vor.u32 %v2160_v48, %v1559_v49  ;;  %v1751_v53 = vld [vmem:[#allocation7 + $0x198] sm:$0xf0]  ;;  %v138_v58 = vld [vmem:[#allocation13] sm:$0x3]  ;;  %v1734_v59 = vor.u32 %v2206_v56, %v1733_v55 }
  0x49   :  { %v1786_v30 = vor.u32 %v2216_v28, %v1783_v29  ;;  %v2204_v57 = vld [vmem:[#allocation7 + $0x16c] sm:$0xf]  ;;  %v1717_v63 = vld [vmem:[#allocation7 + $0x148] sm:$0xf]  ;;  %v1719_v3 = vld [vmem:[#allocation7 + $0x158] sm:$0xf0] }
  0x4a   :  { %v2200_v1 = vld [vmem:[#allocation7 + $0x14c] sm:$0xf]  ;;  %v1701_v4 = vld [vmem:[#allocation7 + $0x128] sm:$0xf]  ;;  %v2198_v5 = vld [vmem:[#allocation7 + $0x134] sm:$0xf0] }
  0x4b   :  { %657 = vmatpush.bf16.msrb.mxu2 %v1654_v37  ;;  %648 = vmatpush.bf16.msra.mxu1 %v1698_v60  ;;  %v1575_v37 = vld [vmem:[#allocation7 + $0x38] sm:$0xf0]  ;;  %v144_v6 = vperm.slane %v138_v58, 0  ;;  %v1722_v7 = vor.u32 %v2200_v1, %v1719_v3  ;;  %v1702_v10 = vor.u32 %v2198_v5, %v1701_v4  ;;  %v1685_v11 = vld [vmem:[#allocation7 + $0x108] sm:$0xf]  ;;  %s1514_s6 = sshll.u32 %s2545_s4, 4  ;;  %s1515_s6 = int_to_ptr.vmem [resolvable:$true] %s1514_s6 }
  0x4c   :  { %685 = vmatpush.bf16.msrb.mxu0 %v1658_v40  ;;  %670 = vmatpush.bf16.msrb.mxu3 %v1798_v13  ;;  %v1578_v39 = vor.u32 %v2164_v36, %v1575_v37  ;;  %v2212_v40 = vld [vmem:[#allocation7 + $0x1ac] sm:$0xf]  ;;  %v1735_v60 = vld [vmem:[#allocation7 + $0x178] sm:$0xf0]  ;;  %v2194_v12 = vld [vmem:[#allocation7 + $0x114] sm:$0xf0] }
  0x4d   :  { %v1770_v42 = vor.u32 %v2212_v40, %v1767_v41  ;;  %v1738_v62 = vor.u32 %v2204_v57, %v1735_v60  ;;  %v1686_v17 = vor.u32 %v2194_v12, %v1685_v11  ;;  %v1687_v19 = vld [vmem:[#allocation7 + $0x118] sm:$0xf0]  ;;  %v1861_v26 = vld [vmem:[#allocation8 + $0x70] sm:$0xf]  ;;  %v1853_v28 = vld [vmem:[#allocation8 + $0x60] sm:$0xf] }
  0x4e   :  { %v2236_v29 = vld [vmem:[#allocation8 + $0x64] sm:$0xf0]  ;;  %v1925_v35 = vld [vmem:[#allocation8 + $0xf0] sm:$0xf]  ;;  %v2254_v36 = vld [vmem:[#allocation8 + $0xf4] sm:$0xf0] }
  0x4f   :  { %658 = vmatpush.bf16.msrb.mxu2 %v1638_v50  ;;  %649 = vmatpush.bf16.msra.mxu1 %v1682_v8  ;;  %v1750_v50 = vor.u32 %v2210_v47, %v1749_v45  ;;  %v2196_v8 = vld [vmem:[#allocation7 + $0x12c] sm:$0xf]  ;;  %v1854_v31 = vor.u32 %v2236_v29, %v1853_v28  ;;  %v1926_v40 = vor.u32 %v2254_v36, %v1925_v35  ;;  %v1917_v41 = vld [vmem:[#allocation8 + $0xe0] sm:$0xf]  ;;  %v1909_v44 = vld [vmem:[#allocation8 + $0xd0] sm:$0xf] }
  0x50   :  { %686 = vmatpush.bf16.msrb.mxu0 %v1642_v52  ;;  %671 = vmatpush.bf16.msrb.mxu3 %v1782_v27  ;;  %v2208_v52 = vld [vmem:[#allocation7 + $0x18c] sm:$0xf]  ;;  %v2238_v27 = vld [vmem:[#allocation8 + $0x74] sm:$0xf0]  ;;  %v1901_v47 = vld [vmem:[#allocation8 + $0xc0] sm:$0xf] }
  0x51   :  { %v1754_v54 = vor.u32 %v2208_v52, %v1751_v53  ;;  %v2250_v45 = vld [vmem:[#allocation8 + $0xd4] sm:$0xf0]  ;;  %v2248_v48 = vld [vmem:[#allocation8 + $0xc4] sm:$0xf0]  ;;  %v1893_v53 = vld [vmem:[#allocation8 + $0xb0] sm:$0xf] }
  0x52   :  { %v1902_v49 = vor.u32 %v2248_v48, %v1901_v47  ;;  %v2053_v55 = vld [vmem:[#allocation8 + $0x1f0] sm:$0xf]  ;;  %v2286_v57 = vld [vmem:[#allocation8 + $0x1f4] sm:$0xf0]  ;;  %v1927_v28 = vld [vmem:[#allocation8 + $0xf8] sm:$0xf0] }
  0x53   :  { %659 = vmatpush.bf16.msrb.mxu2 %v1622_v61  ;;  %698 = vmatpush.bf16.msrb.mxu1 %v1802_v18  ;;  %v2192_v18 = vld [vmem:[#allocation7 + $0x10c] sm:$0xf]  ;;  %v2054_v60 = vor.u32 %v2286_v57, %v2053_v55  ;;  %v1829_v4 = vld [vmem:[#allocation8 + $0x30] sm:$0xf]  ;;  %v2230_v5 = vld [vmem:[#allocation8 + $0x34] sm:$0xf0] }
  0x54   :  { %687 = vmatpush.bf16.msrb.mxu0 %v1626_v0  ;;  %672 = vmatpush.bf16.msrb.mxu3 %v1766_v38  ;;  %v2202_v0 = vld [vmem:[#allocation7 + $0x154] sm:$0xf0]  ;;  %v2037_v12 = vld [vmem:[#allocation8 + $0x1d0] sm:$0xf]  ;;  %v2264_v47 = vld [vmem:[#allocation8 + $0x144] sm:$0xf0] }
  0x55   :  { %v1718_v2 = vor.u32 %v2202_v0, %v1717_v63  ;;  %v2244_v63 = vld [vmem:[#allocation8 + $0xa4] sm:$0xf0]  ;;  %v2045_v0 = vld [vmem:[#allocation8 + $0x1e0] sm:$0xf]  ;;  %v2242_v11 = vld [vmem:[#allocation8 + $0x94] sm:$0xf0] }
  0x56   :  { %v2266_v35 = vld [vmem:[#allocation8 + $0x154] sm:$0xf0]  ;;  %v2237_v48 = vld [vmem:[#allocation8 + $0x74] sm:$0xf]  ;;  %s1516_s15 = sshll.u32 %s2629_s7, 4  ;;  %vm1507_vm1 = vcmask 122880   ;;  %s1517_s15 = int_to_ptr.hbm [resolvable:$true] %s1516_s15 }
  0x57   :  { %660 = vmatpush.bf16.msrb.mxu2 %v1606_v9  ;;  %699 = vmatpush.bf16.msrb.mxu1 %v1786_v30  ;;  %v1703_v9 = vld [vmem:[#allocation7 + $0x138] sm:$0xf0]  ;;  %v145_v30 = vperm.slane %v138_v58, 1  ;;  %v1837_v58 = vld [vmem:[#allocation8 + $0x40] sm:$0xf] }
  0x58   :  { %688 = vmatpush.bf16.msrb.mxu0 %v1610_v16  ;;  %673 = vmatpush.bf16.msrb.mxu3 %v1750_v50  ;;  %v1706_v14 = vor.u32 %v2196_v8, %v1703_v9  ;;  %v1845_v50 = vld [vmem:[#allocation8 + $0x50] sm:$0xf]  ;;  %v2270_v8 = vld [vmem:[#allocation8 + $0x174] sm:$0xf0]  ;;  %v2249_v55 = vld [vmem:[#allocation8 + $0xd4] sm:$0xf] }
  0x5b   :  { %661 = vmatpush.bf16.msrb.mxu2 %v1590_v22  ;;  %700 = vmatpush.bf16.msrb.mxu1 %v1770_v42  ;;  %v1690_v22 = vor.u32 %v2192_v18, %v1687_v19  ;;  %v2252_v42 = vld [vmem:[#allocation8 + $0xe4] sm:$0xf0]  ;;  %v1981_v19 = vld [vmem:[#allocation8 + $0x160] sm:$0xf] }
  0x5c   :  { %689 = vmatpush.bf16.msrb.mxu0 %v1594_v23  ;;  %674 = vmatpush.bf16.msrb.mxu3 %v1734_v59  ;;  %v1862_v23 = vor.u32 %v2238_v27, %v1861_v26  ;;  %v1918_v43 = vor.u32 %v2252_v42, %v1917_v41  ;;  %v2232_v59 = vld [vmem:[#allocation8 + $0x44] sm:$0xf0]  ;;  %v1919_v41 = vld [vmem:[#allocation8 + $0xe8] sm:$0xf0] }
  0x5d   :  { %v2280_v27 = vld [vmem:[#allocation8 + $0x1c4] sm:$0xf0] }
  0x5f   :  { %662 = vmatpush.bf16.msrb.mxu2 %v1574_v34  ;;  %701 = vmatpush.bf16.msrb.mxu1 %v1754_v54  ;;  %v2246_v54 = vld [vmem:[#allocation8 + $0xb4] sm:$0xf0] }
  0x60   :  { %690 = vmatpush.bf16.msrb.mxu0 %v1578_v39  ;;  %675 = vmatpush.bf16.msrb.mxu3 %v1718_v2  ;;  %v1894_v56 = vor.u32 %v2246_v54, %v1893_v53  ;;  %v2284_v2 = vld [vmem:[#allocation8 + $0x1e4] sm:$0xf0] }
  0x61   :  { %v2046_v3 = vor.u32 %v2284_v2, %v2045_v0  ;;  %v2276_v53 = vld [vmem:[#allocation8 + $0x1a4] sm:$0xf0]  ;;  %v2005_v0 = vld [vmem:[#allocation8 + $0x190] sm:$0xf] }
  0x63   :  { %663 = vmatpush.bf16.msrb.mxu2 %v1558_v46  ;;  %702 = vmatpush.bf16.msrb.mxu1 %v1738_v62  ;;  %v1910_v46 = vor.u32 %v2250_v45, %v1909_v44  ;;  %v1885_v62 = vld [vmem:[#allocation8 + $0xa0] sm:$0xf]  ;;  %v2224_v44 = vld [vmem:[#allocation8 + $0x4] sm:$0xf0] }
  0x64   :  { %691 = vmatpush.bf16.msrb.mxu0 %v1562_v51  ;;  %676 = vmatpush.bf16.msrb.mxu3 %v1702_v10  ;;  %v2234_v51 = vld [vmem:[#allocation8 + $0x54] sm:$0xf0]  ;;  %v1886_v1 = vor.u32 %v2244_v63, %v1885_v62  ;;  %v1877_v10 = vld [vmem:[#allocation8 + $0x90] sm:$0xf]  ;;  %v1965_v45 = vld [vmem:[#allocation8 + $0x140] sm:$0xf] }
  0x65   :  { %v1846_v52 = vor.u32 %v2234_v51, %v1845_v50  ;;  %v1966_v50 = vor.u32 %v2264_v47, %v1965_v45  ;;  %v1855_v62 = vld [vmem:[#allocation8 + $0x68] sm:$0xf0]  ;;  %v2281_v45 = vld [vmem:[#allocation8 + $0x1d4] sm:$0xf]  ;;  %v2039_v47 = vld [vmem:[#allocation8 + $0x1d8] sm:$0xf0] }
  0x67   :  { %703 = vmatpush.bf16.msrb.mxu1 %v1722_v7  ;;  %v1830_v7 = vor.u32 %v2230_v5, %v1829_v4  ;;  %v1903_v4 = vld [vmem:[#allocation8 + $0xc8] sm:$0xf0] }
  0x68   :  { %677 = vmatpush.bf16.msrb.mxu3 %v1686_v17 }
  0x6b   :  { %704 = vmatpush.bf16.msrb.mxu1 %v1706_v14  ;;  %v2282_v14 = vld [vmem:[#allocation8 + $0x1d4] sm:$0xf0] }
  0x6c   :  { %v2038_v17 = vor.u32 %v2282_v14, %v2037_v12  ;;  %v1997_v12 = vld [vmem:[#allocation8 + $0x180] sm:$0xf] }
  0x6f   :  { %705 = vmatpush.bf16.msrb.mxu1 %v1690_v22  ;;  %v1869_v22 = vld [vmem:[#allocation8 + $0x80] sm:$0xf] }
  0xa7   :  { %v181_v61 = vpop.f32.mrf.mxu1 }
  0xa8   :  { %v182_v13 = vadd.f32 %v181_v61, %v144_v6  ;;  %v1838_v61 = vor.u32 %v2232_v59, %v1837_v58  ;;  %v1957_v58 = vld [vmem:[#allocation8 + $0x130] sm:$0xf]  ;;  %v2262_v59 = vld [vmem:[#allocation8 + $0x134] sm:$0xf0] }
  0xaa   :  { %v200_v20 = vmax.f32 %v182_v13, 0.0  ;;  %v1878_v13 = vor.u32 %v2242_v11, %v1877_v10  ;;  %v1847_v10 = vld [vmem:[#allocation8 + $0x58] sm:$0xf0] }
  0xaf   :  { %v183_v15 = vpop.f32.mrf.mxu1 }
  0xb0   :  { %v184_v16 = vadd.f32 %v183_v15, %v144_v6  ;;  %v1989_v6 = vld [vmem:[#allocation8 + $0x170] sm:$0xf]  ;;  %v1821_v15 = vld [vmem:[#allocation8 + $0x20] sm:$0xf] }
  0xb1   :  { %v1990_v9 = vor.u32 %v2270_v8, %v1989_v6  ;;  %v1949_v6 = vld [vmem:[#allocation8 + $0x120] sm:$0xf] }
  0xb2   :  { %v202_v21 = vmax.f32 %v184_v16, 0.0  ;;  %v2228_v16 = vld [vmem:[#allocation8 + $0x24] sm:$0xf0] }
  0xb3   :  { %v1822_v18 = vor.u32 %v2228_v16, %v1821_v15  ;;  %v2245_v15 = vld [vmem:[#allocation8 + $0xb4] sm:$0xf]  ;;  %v1895_v16 = vld [vmem:[#allocation8 + $0xb8] sm:$0xf0] }
  0xb4   :  { %v204_v24 = vpack.c.bf16 %v202_v21, %v200_v20  ;;  %v2268_v20 = vld [vmem:[#allocation8 + $0x164] sm:$0xf0] }
  0xb5   :  { %v1982_v21 = vor.u32 %v2268_v20, %v1981_v19  ;;  %v2055_v19 = vld [vmem:[#allocation8 + $0x1f8] sm:$0xf0]  ;;  %v1941_v20 = vld [vmem:[#allocation8 + $0x110] sm:$0xf] }
  0xb6   :  { %608 = vmatmul.bf16.vlgmr.msra.gmra.mxu2 %v204_v24  ;;  %636 = vmatmul.bf16.vlgmr.msra.gmra.mxu0 %v204_v24 }
  0xb7   :  { %v195_v25 = vpop.f32.mrf.mxu1  ;;  %1114 = vmatpush.bf16.msra.mxu2 %v1862_v23  ;;  %1142 = vmatpush.bf16.msra.mxu0 %v1990_v9  ;;  %v2253_v23 = vld [vmem:[#allocation8 + $0xf4] sm:$0xf] }
  0xb8   :  { %v196_v32 = vadd.f32 %v195_v25, %v145_v30  ;;  %v2029_v25 = vld [vmem:[#allocation8 + $0x1c0] sm:$0xf]  ;;  %v2233_v9 = vld [vmem:[#allocation8 + $0x54] sm:$0xf] }
  0xb9   :  { %v2030_v29 = vor.u32 %v2280_v27, %v2029_v25  ;;  %v1850_v11 = vor.u32 %v2233_v9, %v1847_v10  ;;  %v2231_v25 = vld [vmem:[#allocation8 + $0x44] sm:$0xf] }
  0xba   :  { %v201_v37 = vmax.f32 %v196_v32, 0.0  ;;  %v2226_v32 = vld [vmem:[#allocation8 + $0x14] sm:$0xf0]  ;;  %v2223_v10 = vld [vmem:[#allocation8 + $0x4] sm:$0xf] }
  0xbb   :  { %1115 = vmatpush.bf16.msra.mxu2 %v1854_v31  ;;  %1143 = vmatpush.bf16.msra.mxu0 %v1982_v21  ;;  %v1813_v31 = vld [vmem:[#allocation8 + $0x10] sm:$0xf]  ;;  %v2258_v21 = vld [vmem:[#allocation8 + $0x114] sm:$0xf0] }
  0xbf   :  { %v197_v33 = vpop.f32.mrf.mxu1  ;;  %1116 = vmatpush.bf16.msra.mxu2 %v1846_v52  ;;  %v2013_v52 = vld [vmem:[#allocation8 + $0x1a0] sm:$0xf] }
  0xc0   :  { %v198_v34 = vadd.f32 %v197_v33, %v145_v30  ;;  %v1930_v30 = vor.u32 %v2253_v23, %v1927_v28  ;;  %v1973_v33 = vld [vmem:[#allocation8 + $0x150] sm:$0xf]  ;;  %v2014_v54 = vor.u32 %v2276_v53, %v2013_v52  ;;  %v2243_v23 = vld [vmem:[#allocation8 + $0xa4] sm:$0xf]  ;;  %v1887_v28 = vld [vmem:[#allocation8 + $0xa8] sm:$0xf0] }
  0xc1   :  { %v1974_v36 = vor.u32 %v2266_v35, %v1973_v33  ;;  %v2256_v33 = vld [vmem:[#allocation8 + $0x104] sm:$0xf0]  ;;  %v1983_v53 = vld [vmem:[#allocation8 + $0x168] sm:$0xf0] }
  0xc2   :  { %v203_v38 = vmax.f32 %v198_v34, 0.0  ;;  %v1814_v34 = vor.u32 %v2226_v32, %v1813_v31  ;;  %v2047_v31 = vld [vmem:[#allocation8 + $0x1e8] sm:$0xf0]  ;;  %v1933_v32 = vld [vmem:[#allocation8 + $0x100] sm:$0xf] }
  0xc3   :  { %1117 = vmatpush.bf16.msra.mxu2 %v1838_v61  ;;  %1144 = vmatpush.bf16.msra.mxu0 %v1974_v36  ;;  %v2235_v61 = vld [vmem:[#allocation8 + $0x64] sm:$0xf]  ;;  %v1934_v35 = vor.u32 %v2256_v33, %v1933_v32  ;;  %v2229_v36 = vld [vmem:[#allocation8 + $0x34] sm:$0xf] }
  0xc4   :  { %v205_v39 = vpack.c.bf16 %v203_v38, %v201_v37  ;;  %v2021_v37 = vld [vmem:[#allocation8 + $0x1b0] sm:$0xf]  ;;  %v2278_v38 = vld [vmem:[#allocation8 + $0x1b4] sm:$0xf0]  ;;  %v1858_v63 = vor.u32 %v2235_v61, %v1855_v62  ;;  %v2225_v62 = vld [vmem:[#allocation8 + $0x14] sm:$0xf] }
  0xc6   :  { %622 = vmatmul.bf16.vlgmr.msra.gmra.mxu3 %v205_v39  ;;  %650 = vmatmul.bf16.vlgmr.msra.gmra.mxu1 %v205_v39 }
  0xc7   :  { %664 = vmatmul.bf16.vlgmr.msrb.gmra.mxu2 %v204_v24  ;;  %692 = vmatmul.bf16.vlgmr.msrb.gmra.mxu0 %v204_v24  ;;  %v2240_v24 = vld [vmem:[#allocation8 + $0x84] sm:$0xf0] }
  0xc8   :  { %1128 = vmatpush.bf16.msra.mxu3 %v1926_v40  ;;  %1156 = vmatpush.bf16.msra.mxu1 %v2054_v60  ;;  %v1870_v26 = vor.u32 %v2240_v24, %v1869_v22  ;;  %v2251_v40 = vld [vmem:[#allocation8 + $0xe4] sm:$0xf]  ;;  %v1958_v60 = vor.u32 %v2262_v59, %v1957_v58  ;;  %v1942_v24 = vor.u32 %v2258_v21, %v1941_v20  ;;  %v2031_v59 = vld [vmem:[#allocation8 + $0x1c8] sm:$0xf0]  ;;  %v2261_v20 = vld [vmem:[#allocation8 + $0x134] sm:$0xf] }
  0xc9   :  { %1118 = vmatpush.bf16.msra.mxu2 %v1830_v7  ;;  %v1922_v42 = vor.u32 %v2251_v40, %v1919_v41  ;;  %1145 = vmatpush.bf16.msra.mxu0 %v1966_v50  ;;  %v2260_v7 = vld [vmem:[#allocation8 + $0x124] sm:$0xf0]  ;;  %v1991_v40 = vld [vmem:[#allocation8 + $0x178] sm:$0xf0]  ;;  %v1823_v50 = vld [vmem:[#allocation8 + $0x28] sm:$0xf0] }
  0xca   :  { %v1950_v8 = vor.u32 %v2260_v7, %v1949_v6  ;;  %v2023_v6 = vld [vmem:[#allocation8 + $0x1b8] sm:$0xf0] }
  0xcb   :  { %v1959_v21 = vld [vmem:[#allocation8 + $0x138] sm:$0xf0] }
  0xcc   :  { %1129 = vmatpush.bf16.msra.mxu3 %v1918_v43  ;;  %1157 = vmatpush.bf16.msra.mxu1 %v2046_v3  ;;  %v1805_v43 = vld [vmem:[#allocation8] sm:$0xf]  ;;  %v2247_v3 = vld [vmem:[#allocation8 + $0xc4] sm:$0xf] }
  0xcd   :  { %1119 = vmatpush.bf16.msra.mxu2 %v1822_v18  ;;  %1146 = vmatpush.bf16.msra.mxu0 %v1958_v60  ;;  %v1906_v5 = vor.u32 %v2247_v3, %v1903_v4  ;;  %v1898_v18 = vor.u32 %v2245_v15, %v1895_v16  ;;  %v2613_v3 = vld [vmem:[#allocation13 + $0x2] sm:$0xf]  ;;  %v1967_v15 = vld [vmem:[#allocation8 + $0x148] sm:$0xf0] }
  0xd0   :  { %1130 = vmatpush.bf16.msra.mxu3 %v1910_v46  ;;  %1158 = vmatpush.bf16.msra.mxu1 %v2038_v17  ;;  %v1806_v46 = vor.u32 %v2224_v44, %v1805_v43  ;;  %v2285_v17 = vld [vmem:[#allocation8 + $0x1f4] sm:$0xf]  ;;  %v1879_v44 = vld [vmem:[#allocation8 + $0x98] sm:$0xf0] }
  0xd1   :  { %1120 = vmatpush.bf16.msra.mxu2 %v1814_v34  ;;  %1147 = vmatpush.bf16.msra.mxu0 %v1950_v8  ;;  %v2058_v22 = vor.u32 %v2285_v17, %v2055_v19  ;;  %v2241_v43 = vld [vmem:[#allocation8 + $0x94] sm:$0xf]  ;;  %v2275_v17 = vld [vmem:[#allocation8 + $0x1a4] sm:$0xf] }
  0xd4   :  { %1131 = vmatpush.bf16.msra.mxu3 %v1902_v49  ;;  %1159 = vmatpush.bf16.msra.mxu1 %v2030_v29  ;;  %v1863_v49 = vld [vmem:[#allocation8 + $0x78] sm:$0xf0]  ;;  %v2283_v29 = vld [vmem:[#allocation8 + $0x1e4] sm:$0xf] }
  0xd5   :  { %v1866_v51 = vor.u32 %v2237_v48, %v1863_v49  ;;  %1121 = vmatpush.bf16.msra.mxu2 %v1806_v46  ;;  %1148 = vmatpush.bf16.msra.mxu0 %v1942_v24  ;;  %v2050_v34 = vor.u32 %v2283_v29, %v2047_v31  ;;  %v1882_v46 = vor.u32 %v2241_v43, %v1879_v44  ;;  %v2227_v49 = vld [vmem:[#allocation8 + $0x24] sm:$0xf]  ;;  %v272_v31 = vperm.slane %v2613_v3, 0 }
  0xd6   :  { %678 = vmatmul.bf16.vlgmr.msrb.gmra.mxu3 %v205_v39  ;;  %706 = vmatmul.bf16.vlgmr.msrb.gmra.mxu1 %v205_v39  ;;  %v2022_v39 = vor.u32 %v2278_v38, %v2021_v37  ;;  %v1831_v37 = vld [vmem:[#allocation8 + $0x38] sm:$0xf0]  ;;  %v2269_v38 = vld [vmem:[#allocation8 + $0x174] sm:$0xf]  ;;  %v2042_v48 = vor.u32 %v2281_v45, %v2039_v47  ;;  %v1826_v52 = vor.u32 %v2227_v49, %v1823_v50 }
  0xd7   :  { %v1962_v24 = vor.u32 %v2261_v20, %v1959_v21  ;;  %v2291_v20 = vld [vmem:[#allocation10 + $0x20] sm:$0xff]  ;;  %v2290_v21 = vld [vmem:[#allocation10 + $0x18] sm:$0xff] }
  0xd8   :  { %1132 = vmatpush.bf16.msra.mxu3 %v1894_v56  ;;  %1160 = vmatpush.bf16.msra.mxu1 %v2022_v39  ;;  %v1911_v56 = vld [vmem:[#allocation8 + $0xd8] sm:$0xf0]  ;;  %v1834_v39 = vor.u32 %v2229_v36, %v1831_v37 }
  0xd9   :  { %1170 = vmatpush.bf16.msrb.mxu2 %v1866_v51  ;;  %v1914_v57 = vor.u32 %v2249_v55, %v1911_v56  ;;  %1149 = vmatpush.bf16.msra.mxu0 %v1934_v35  ;;  %v2267_v51 = vld [vmem:[#allocation8 + $0x164] sm:$0xf]  ;;  %v1871_v56 = vld [vmem:[#allocation8 + $0x88] sm:$0xf0] }
  0xda   :  { %v2239_v55 = vld [vmem:[#allocation8 + $0x84] sm:$0xf]  ;;  %v1999_v35 = vld [vmem:[#allocation8 + $0x188] sm:$0xf0] }
  0xdb   :  { %v1874_v58 = vor.u32 %v2239_v55, %v1871_v56 }
  0xdc   :  { %1133 = vmatpush.bf16.msra.mxu3 %v1886_v1  ;;  %1161 = vmatpush.bf16.msra.mxu1 %v2014_v54  ;;  %v2274_v1 = vld [vmem:[#allocation8 + $0x194] sm:$0xf0]  ;;  %v1986_v54 = vor.u32 %v2267_v51, %v1983_v53  ;;  %v1935_v53 = vld [vmem:[#allocation8 + $0x108] sm:$0xf0] }
  0xdd   :  { %v2006_v2 = vor.u32 %v2274_v1, %v2005_v0  ;;  %1171 = vmatpush.bf16.msrb.mxu2 %v1858_v63  ;;  %v1815_v63 = vld [vmem:[#allocation8 + $0x18] sm:$0xf0]  ;;  %v2265_v0 = vld [vmem:[#allocation8 + $0x154] sm:$0xf] }
  0xde   :  { %v1818_v1 = vor.u32 %v2225_v62, %v1815_v63 }
  0xe0   :  { %1134 = vmatpush.bf16.msra.mxu3 %v1878_v13  ;;  %1162 = vmatpush.bf16.msra.mxu1 %v2006_v2  ;;  %v2272_v13 = vld [vmem:[#allocation8 + $0x184] sm:$0xf0]  ;;  %v1975_v2 = vld [vmem:[#allocation8 + $0x158] sm:$0xf0] }
  0xe1   :  { %v1998_v14 = vor.u32 %v2272_v13, %v1997_v12  ;;  %1172 = vmatpush.bf16.msrb.mxu2 %v1850_v11  ;;  %v1978_v4 = vor.u32 %v2265_v0, %v1975_v2  ;;  %v1807_v11 = vld [vmem:[#allocation8 + $0x8] sm:$0xf0]  ;;  %v2263_v12 = vld [vmem:[#allocation8 + $0x144] sm:$0xf]  ;;  %v273_v13 = vperm.slane %v2613_v3, 1  ;;  %v274_v0 = vperm.slane %v2613_v3, 2 }
  0xe2   :  { %v1970_v16 = vor.u32 %v2263_v12, %v1967_v15 }
  0xe4   :  { %1135 = vmatpush.bf16.msra.mxu3 %v1870_v26  ;;  %v1839_v26 = vld [vmem:[#allocation8 + $0x48] sm:$0xf0]  ;;  %1163 = vmatpush.bf16.msra.mxu1 %v1998_v14  ;;  %v1810_v14 = vor.u32 %v2223_v10, %v1807_v11 }
  0xe5   :  { %v1842_v27 = vor.u32 %v2231_v25, %v1839_v26  ;;  %v2273_v25 = vld [vmem:[#allocation8 + $0x194] sm:$0xf]  ;;  %v2007_v26 = vld [vmem:[#allocation8 + $0x198] sm:$0xf0] }
  0xe6   :  { %v2010_v29 = vor.u32 %v2273_v25, %v2007_v26  ;;  %v2301_v25 = vld [vmem:[#allocation10 + $0x70] sm:$0xff]  ;;  %v2288_v26 = vld [vmem:[#allocation10 + $0x8] sm:$0xff] }
  0xe7   :  { %1173 = vmatpush.bf16.msrb.mxu2 %v1842_v27  ;;  %v2259_v27 = vld [vmem:[#allocation8 + $0x124] sm:$0xf] }
  0xe8   :  { %1184 = vmatpush.bf16.msrb.mxu3 %v1930_v30  ;;  %1212 = vmatpush.bf16.msrb.mxu1 %v2058_v22  ;;  %v1890_v30 = vor.u32 %v2243_v23, %v1887_v28 }
  0xeb   :  { %1174 = vmatpush.bf16.msrb.mxu2 %v1834_v39  ;;  %v2257_v39 = vld [vmem:[#allocation8 + $0x114] sm:$0xf] }
  0xec   :  { %1185 = vmatpush.bf16.msrb.mxu3 %v1922_v42  ;;  %1213 = vmatpush.bf16.msrb.mxu1 %v2050_v34  ;;  %v1994_v42 = vor.u32 %v2269_v38, %v1991_v40  ;;  %v2271_v34 = vld [vmem:[#allocation8 + $0x184] sm:$0xf]  ;;  %v1943_v40 = vld [vmem:[#allocation8 + $0x118] sm:$0xf0] }
  0xee   :  { %1198 = vmatpush.bf16.msrb.mxu0 %v1994_v42  ;;  %v2002_v42 = vor.u32 %v2271_v34, %v1999_v35  ;;  %v2296_v34 = vld [vmem:[#allocation10 + $0x48] sm:$0xff] }
  0xef   :  { %1175 = vmatpush.bf16.msrb.mxu2 %v1826_v52  ;;  %v2255_v52 = vld [vmem:[#allocation8 + $0x104] sm:$0xf] }
  0xf0   :  { %1186 = vmatpush.bf16.msrb.mxu3 %v1914_v57  ;;  %1214 = vmatpush.bf16.msrb.mxu1 %v2042_v48  ;;  %v2279_v57 = vld [vmem:[#allocation8 + $0x1c4] sm:$0xf]  ;;  %v1938_v56 = vor.u32 %v2255_v52, %v1935_v53 }
  0xf1   :  { %v2034_v61 = vor.u32 %v2279_v57, %v2031_v59  ;;  %v275_v57 = vperm.slane %v2613_v3, 3  ;;  %v2294_v3 = vld [vmem:[#allocation10 + $0x38] sm:$0xff] }
  0xf2   :  { %1199 = vmatpush.bf16.msrb.mxu0 %v1986_v54 }
  0xf3   :  { %1176 = vmatpush.bf16.msrb.mxu2 %v1818_v1 }
  0xf4   :  { %1187 = vmatpush.bf16.msrb.mxu3 %v1906_v5  ;;  %1215 = vmatpush.bf16.msrb.mxu1 %v2034_v61  ;;  %v2277_v5 = vld [vmem:[#allocation8 + $0x1b4] sm:$0xf] }
  0xf5   :  { %v2026_v7 = vor.u32 %v2277_v5, %v2023_v6 }
  0xf6   :  { %1200 = vmatpush.bf16.msrb.mxu0 %v1978_v4 }
  0xf7   :  { %1177 = vmatpush.bf16.msrb.mxu2 %v1810_v14 }
  0xf8   :  { %1188 = vmatpush.bf16.msrb.mxu3 %v1898_v18  ;;  %1216 = vmatpush.bf16.msrb.mxu1 %v2026_v7  ;;  %v2015_v18 = vld [vmem:[#allocation8 + $0x1a8] sm:$0xf0] }
  0xf9   :  { %v2018_v19 = vor.u32 %v2275_v17, %v2015_v18  ;;  %v2293_v18 = vld [vmem:[#allocation10 + $0x30] sm:$0xff] }
  0xfa   :  { %1201 = vmatpush.bf16.msrb.mxu0 %v1970_v16 }
  0xfc   :  { %1189 = vmatpush.bf16.msrb.mxu3 %v1890_v30  ;;  %1217 = vmatpush.bf16.msrb.mxu1 %v2018_v19  ;;  %v1951_v30 = vld [vmem:[#allocation8 + $0x128] sm:$0xf0] }
  0xfd   :  { %v1954_v37 = vor.u32 %v2259_v27, %v1951_v30  ;;  %v2292_v19 = vld [vmem:[#allocation10 + $0x28] sm:$0xff]  ;;  %v2297_v30 = vld [vmem:[#allocation10 + $0x50] sm:$0xff] }
  0xfe   :  { %1202 = vmatpush.bf16.msrb.mxu0 %v1962_v24  ;;  %v2289_v24 = vld [vmem:[#allocation10 + $0x10] sm:$0xff]  ;;  %v2300_v27 = vld [vmem:[#allocation10 + $0x68] sm:$0xff] }
 0x100   :  { %1190 = vmatpush.bf16.msrb.mxu3 %v1882_v46  ;;  %1218 = vmatpush.bf16.msrb.mxu1 %v2010_v29  ;;  %v1946_v46 = vor.u32 %v2257_v39, %v1943_v40  ;;  %v2298_v29 = vld [vmem:[#allocation10 + $0x58] sm:$0xff] }
 0x102   :  { %1203 = vmatpush.bf16.msrb.mxu0 %v1954_v37  ;;  %v2295_v37 = vld [vmem:[#allocation10 + $0x40] sm:$0xff] }
 0x104   :  { %1191 = vmatpush.bf16.msrb.mxu3 %v1874_v58  ;;  %1219 = vmatpush.bf16.msrb.mxu1 %v2002_v42 }
 0x106   :  { %1204 = vmatpush.bf16.msrb.mxu0 %v1946_v46 }
 0x10a   :  { %1205 = vmatpush.bf16.msrb.mxu0 %v1938_v56 }
 0x133   :  { %v637_v41 = vpop.f32.mrf.mxu0 }
 0x134   :  { %v638_v22 = vadd.f32 %v637_v41, %v273_v13 }
 0x139   :  { %v609_v60 = vpop.f32.mrf.mxu2 }
 0x13a   :  { %v610_v43 = vadd.f32 %v609_v60, %v272_v31 }
 0x13b   :  { %v639_v8 = vpop.f32.mrf.mxu0 }
 0x13c   :  { %v640_v32 = vadd.f32 %v639_v8, %v273_v13 }
 0x141   :  { %v611_v23 = vpop.f32.mrf.mxu2 }
 0x142   :  { %v612_v47 = vadd.f32 %v611_v23, %v272_v31  ;;  %v2287_v23 = vld [vmem:[#allocation10] sm:$0xff] }
 0x143   :  { %v651_v9 = vpop.f32.mrf.mxu1 }
 0x144   :  { %v652_v33 = vadd.f32 %v651_v9, %v638_v22  ;;  %v693_v41 = vpop.f32.mrf.mxu0  ;;  %v2302_v22 = vld [vmem:[#allocation10 + $0x78] sm:$0xff] }
 0x145   :  { %v694_v62 = vadd.f32 %v693_v41, %v275_v57 }
 0x146   :  { %v713_v44 = vmax.f32 %v652_v33, 0.0  ;;  %v724_v33 = vld [vmem:[#allocation13 + $0x6] sm:$0x3] }
 0x147   :  { %v790_v35 = vperm.slane %v724_v33, 0 }
 0x149   :  { %v623_v28 = vpop.f32.mrf.mxu3 }
 0x14a   :  { %v624_v48 = vadd.f32 %v623_v28, %v610_v43  ;;  %v665_v54 = vpop.f32.mrf.mxu2  ;;  %v2299_v28 = vld [vmem:[#allocation10 + $0x60] sm:$0xff] }
 0x14b   :  { %v653_v36 = vpop.f32.mrf.mxu1  ;;  %v666_v7 = vadd.f32 %v665_v54, %v274_v0 }
 0x14c   :  { %v654_v38 = vadd.f32 %v653_v36, %v640_v32  ;;  %v712_v58 = vmax.f32 %v624_v48, 0.0  ;;  %v695_v61 = vpop.f32.mrf.mxu0 }
 0x14d   :  { %v696_v1 = vadd.f32 %v695_v61, %v275_v57 }
 0x14e   :  { %v717_v45 = vmax.f32 %v654_v38, 0.0 }
 0x150   :  { %v721_v49 = vpack.c.bf16 %v717_v45, %v713_v44 }
 0x151   :  { %v625_v50 = vpop.f32.mrf.mxu3 }
 0x152   :  { %v626_v51 = vadd.f32 %v625_v50, %v612_v47  ;;  %1136 = vmatmul.bf16.vlgmr.msra.gmra.mxu3 %v721_v49  ;;  %v667_v6 = vpop.f32.mrf.mxu2 }
 0x153   :  { %v707_v55 = vpop.f32.mrf.mxu1  ;;  %v668_v10 = vadd.f32 %v667_v6, %v274_v0  ;;  %1378 = vmatpush.bf16.msra.mxu3 %v2302_v22 }
 0x154   :  { %v716_v59 = vmax.f32 %v626_v51, 0.0  ;;  %v708_v2 = vadd.f32 %v707_v55, %v694_v62  ;;  %v791_v51 = vperm.slane %v724_v33, 1  ;;  %v2328_v33 = vld [vmem:[#allocation13 + $0x9] ss:$0 sm:$0xff] }
 0x156   :  { %v720_v60 = vpack.c.bf16 %v716_v59, %v712_v58  ;;  %v715_v8 = vmax.f32 %v708_v2, 0.0 }
 0x157   :  { %1379 = vmatpush.bf16.msra.mxu3 %v2301_v25 }
 0x158   :  { %1122 = vmatmul.bf16.vlgmr.msra.gmra.mxu2 %v720_v60 }
 0x159   :  { %v679_v63 = vpop.f32.mrf.mxu3  ;;  %1364 = vmatpush.bf16.msra.mxu2 %v2294_v3  ;;  %v2303_v3 = vld [vmem:[#allocation11] sm:$0xff] }
 0x15a   :  { %v680_v11 = vadd.f32 %v679_v63, %v666_v7 }
 0x15b   :  { %v709_v4 = vpop.f32.mrf.mxu1  ;;  %1380 = vmatpush.bf16.msra.mxu3 %v2300_v27 }
 0x15c   :  { %v710_v5 = vadd.f32 %v709_v4, %v696_v1  ;;  %v714_v15 = vmax.f32 %v680_v11, 0.0  ;;  %v2310_v11 = vld [vmem:[#allocation11 + $0x38] sm:$0xff] }
 0x15d   :  { %1365 = vmatpush.bf16.msra.mxu2 %v2293_v18 }
 0x15e   :  { %v719_v9 = vmax.f32 %v710_v5, 0.0 }
 0x15f   :  { %1381 = vmatpush.bf16.msra.mxu3 %v2299_v28 }
 0x160   :  { %v723_v12 = vpack.c.bf16 %v719_v9, %v715_v8 }
 0x161   :  { %v681_v13 = vpop.f32.mrf.mxu3  ;;  %1366 = vmatpush.bf16.msra.mxu2 %v2292_v19 }
 0x162   :  { %v682_v14 = vadd.f32 %v681_v13, %v668_v10  ;;  %1164 = vmatmul.bf16.vlgmr.msra.gmra.mxu1 %v723_v12  ;;  %1192 = vmatmul.bf16.vlgmr.msrb.gmra.mxu3 %v721_v49  ;;  %v2308_v13 = vld [vmem:[#allocation11 + $0x28] sm:$0xff] }
 0x163   :  { %1382 = vmatpush.bf16.msra.mxu3 %v2298_v29 }
 0x164   :  { %v718_v16 = vmax.f32 %v682_v14, 0.0  ;;  %v2307_v14 = vld [vmem:[#allocation11 + $0x20] sm:$0xff] }
 0x165   :  { %1367 = vmatpush.bf16.msra.mxu2 %v2291_v20  ;;  %v2327_v20 = vld [vmem:[#allocation13 + $0x8] ss:$0 sm:$0xff] }
 0x166   :  { %v722_v17 = vpack.c.bf16 %v718_v16, %v714_v15  ;;  %v2306_v15 = vld [vmem:[#allocation11 + $0x18] sm:$0xff]  ;;  %v2305_v16 = vld [vmem:[#allocation11 + $0x10] sm:$0xff] }
 0x167   :  { %1383 = vmatpush.bf16.msra.mxu3 %v2297_v30  ;;  %v1480_v30 = vld [vmem:[#allocation13 + $0xb] sm:$0x1] }
 0x168   :  { %1150 = vmatmul.bf16.vlgmr.msra.gmra.mxu0 %v722_v17  ;;  %1178 = vmatmul.bf16.vlgmr.msrb.gmra.mxu2 %v720_v60 }
 0x169   :  { %1368 = vmatpush.bf16.msra.mxu2 %v2290_v21  ;;  %1463 = vmatpush.bf16.msra.mxu0 %v2310_v11 }
 0x16b   :  { %1384 = vmatpush.bf16.msra.mxu3 %v2296_v34 }
 0x16d   :  { %1369 = vmatpush.bf16.msra.mxu2 %v2289_v24 }
 0x16f   :  { %1385 = vmatpush.bf16.msra.mxu3 %v2295_v37 }
 0x171   :  { %1370 = vmatpush.bf16.msra.mxu2 %v2288_v26 }
 0x172   :  { %1220 = vmatmul.bf16.vlgmr.msrb.gmra.mxu1 %v723_v12  ;;  %v2309_v12 = vld [vmem:[#allocation11 + $0x30] sm:$0xff] }
 0x173   :  { %1464 = vmatpush.bf16.msra.mxu0 %v2309_v12 }
 0x175   :  { %1371 = vmatpush.bf16.msra.mxu2 %v2287_v23 }
 0x177   :  { %1465 = vmatpush.bf16.msra.mxu0 %v2308_v13 }
 0x178   :  { %1206 = vmatmul.bf16.vlgmr.msrb.gmra.mxu0 %v722_v17  ;;  %v2304_v17 = vld [vmem:[#allocation11 + $0x8] sm:$0xff] }
 0x17b   :  { %1466 = vmatpush.bf16.msra.mxu0 %v2307_v14 }
 0x17f   :  { %1467 = vmatpush.bf16.msra.mxu0 %v2306_v15 }
 0x183   :  { %1468 = vmatpush.bf16.msra.mxu0 %v2305_v16 }
 0x187   :  { %1469 = vmatpush.bf16.msra.mxu0 %v2304_v17 }
 0x18b   :  { %1470 = vmatpush.bf16.msra.mxu0 %v2303_v3 }
 0x1d5   :  { %v1137_v32 = vpop.f32.mrf.mxu3 }
 0x1db   :  { %v1123_v31 = vpop.f32.mrf.mxu2 }
 0x1dc   :  { %v1124_v39 = vadd.f32 %v1123_v31, %v790_v35  ;;  %v2544_v31 = vmov 0  }
 0x1dd   :  { %v1139_v41 = vpop.f32.mrf.mxu3  ;;  %2326 = vset.pattern.permute.xlu0 %v2544_v31 }
 0x1de   :  { %v1138_v43 = vadd.f32 %v1137_v32, %v1124_v39  ;;  %1483 = vperm.xlu0 %2326, %v1480_v30   ;;  %v1479_v39 = vld [vmem:[#allocation13 + $0xa] sm:$0x1] }
 0x1df   :  { %v1165_v36 = vpop.f32.mrf.mxu1 }
 0x1e3   :  { %v1125_v38 = vpop.f32.mrf.mxu2 }
 0x1e4   :  { %v1126_v42 = vadd.f32 %v1125_v38, %v790_v35 }
 0x1e5   :  { %v1151_v40 = vpop.f32.mrf.mxu0  ;;  %v1193_v53 = vpop.f32.mrf.mxu3 }
 0x1e6   :  { %v1152_v44 = vadd.f32 %v1151_v40, %v1138_v43  ;;  %v1140_v47 = vadd.f32 %v1139_v41, %v1126_v42 }
 0x1e7   :  { %v1167_v45 = vpop.f32.mrf.mxu1 }
 0x1e8   :  { %v1166_v49 = vadd.f32 %v1165_v36, %v1152_v44 }
 0x1ea   :  { %v1226_v54 = vmax.f32 %v1166_v49, 0.0 }
 0x1eb   :  { %v1179_v46 = vpop.f32.mrf.mxu2 }
 0x1ec   :  { %v1180_v56 = vadd.f32 %v1179_v46, %v791_v51 }
 0x1ed   :  { %v1153_v48 = vpop.f32.mrf.mxu0  ;;  %v1195_v0 = vpop.f32.mrf.mxu3 }
 0x1ee   :  { %v1154_v50 = vadd.f32 %v1153_v48, %v1140_v47  ;;  %v1194_v62 = vadd.f32 %v1193_v53, %v1180_v56 }
 0x1ef   :  { %v1221_v58 = vpop.f32.mrf.mxu1 }
 0x1f0   :  { %v1168_v52 = vadd.f32 %v1167_v45, %v1154_v50 }
 0x1f2   :  { %v1228_v55 = vmax.f32 %v1168_v52, 0.0 }
 0x1f3   :  { %v1181_v59 = vpop.f32.mrf.mxu2 }
 0x1f4   :  { %v1230_v57 = vpack.c.bf16 %v1228_v55, %v1226_v54  ;;  %v1182_v61 = vadd.f32 %v1181_v59, %v791_v51 }
 0x1f5   :  { %v1207_v60 = vpop.f32.mrf.mxu0 }
 0x1f6   :  { %1372 = vmatmul.bf16.vlgmr.msra.gmra.mxu2 %v1230_v57  ;;  %v1208_v63 = vadd.f32 %v1207_v60, %v1194_v62  ;;  %v1196_v1 = vadd.f32 %v1195_v0, %v1182_v61 }
 0x1f7   :  { %v1223_v6 = vpop.f32.mrf.mxu1 }
 0x1f8   :  { %v1222_v4 = vadd.f32 %v1221_v58, %v1208_v63 }
 0x1fa   :  { %v1227_v8 = vmax.f32 %v1222_v4, 0.0 }
 0x1fd   :  { %v1209_v2 = vpop.f32.mrf.mxu0 }
 0x1fe   :  { %v1210_v5 = vadd.f32 %v1209_v2, %v1196_v1 }
 0x200   :  { %v1224_v7 = vadd.f32 %v1223_v6, %v1210_v5 }
 0x202   :  { %v1229_v9 = vmax.f32 %v1224_v7, 0.0 }
 0x204   :  { %v1231_v10 = vpack.c.bf16 %v1229_v9, %v1227_v8 }
 0x206   :  { %1386 = vmatmul.bf16.vlgmr.msra.gmra.mxu3 %v1231_v10 }
 0x250   :  { %v1484_v40 = vpop.permute.xlu0 %1483 }
 0x251   :  { %v1486_v41 = vperm.slane %v1484_v40, 0 }
 0x279   :  { %v1373_v18 = vpop.f32.mrf.mxu2 }
 0x27a   :  { %v1374_v22 = vadd.f32 %v2327_v20, %v1373_v18 }
 0x281   :  { %v1375_v21 = vpop.f32.mrf.mxu2 }
 0x282   :  { %v1376_v24 = vadd.f32 %v2327_v20, %v1375_v21 }
 0x289   :  { %v1387_v19 = vpop.f32.mrf.mxu3 }
 0x28a   :  { %v1388_v25 = vadd.f32 %v1387_v19, %v1374_v22 }
 0x28c   :  { %v1392_v23 = vmax.f32 %v1388_v25, 0.0 }
 0x291   :  { %v1389_v26 = vpop.f32.mrf.mxu3 }
 0x292   :  { %v1390_v27 = vadd.f32 %v1389_v26, %v1376_v24 }
 0x294   :  { %v1393_v28 = vmax.f32 %v1390_v27, 0.0 }
 0x296   :  { %v1394_v29 = vpack.c.bf16 %v1393_v28, %v1392_v23 }
 0x298   :  { %1471 = vmatmul.bf16.vlgmr.msra.gmra.mxu0 %v1394_v29 }
 0x315   :  { %v1472_v32 = vpop.f32.mrf.mxu0 }
 0x316   :  { %v1473_v36 = vadd.f32 %v2328_v33, %v1472_v32 }
 0x318   :  { %v1477_v38 = vmax.f32 %v1473_v36, 0.0 }
 0x31d   :  { %v1474_v34 = vpop.f32.mrf.mxu0 }
 0x31e   :  { %v1475_v35 = vadd.f32 %v2328_v33, %v1474_v34 }
 0x320   :  { %v1478_v37 = vmax.f32 %v1475_v35, 0.0 }
 0x322   :  { %1501 = vmatpush.xpose.msra.mxu1 %v1478_v37 }
 0x326   :  { %1502 = vmatpush.xpose.msra.mxu1 %v1477_v38 }
 0x329   :  { %1503 = vmatmul.f32.vlgmr.msra.gmra.mxu1 %v1479_v39 }
 0x3a6   :  { %v1504_v42 = vpop.f32.mrf.mxu1 }
 0x3a7   :  { %v1505_v43 = vadd.f32 %v1504_v42, %v1486_v41 }
 0x3a9   :  { %1508 = vst.msk [vmem:[#allocation14] sm:$0x1] %vm1507_vm1, %v1505_v43 }
 0x3aa   :  { %1519 = dma.vmem_to_hbm [thread:$0]  %s1515_s6, 16, %s1517_s15, [#allocation4]  }
 0x3ab   :  { %2529 = dma.done.wait [#allocation4], 16  }
 0x3ac   :  { %2530 = vsyncadd [#allocation4], 4294967280 }
 0x3ad   :  { %1524 = vsyncpa [#allocation3], 1 }
 0x3ae   :  { %1525 = vsyncpa [#allocation6], 1 }
 0x3af   :  { %1526 = vsyncpa [#allocation9], 1 }
 0x3b0   :  { %1527 = vsyncpa [#allocation12], 1 }
 0x3b1   :  { %1528 = vsyncpa [#allocation4], 1 }

</bundles_post_ra>
